<compile_context>
chip_gen: v6e
topology: v6e:2x2x1
jax: 0.10.0
libtpu: 0.0.40
codegen_flags: <defaults>
</compile_context>

<pallas_src>
import functools

import numpy as np

import jax
import jax.numpy as jnp
from jax import lax
from jax.experimental import pallas as pl
from jax.experimental.pallas import tpu as pltpu

# ---- module "parameters" (constructor scalars), deterministic --------------
WEIGHT_ROTE = 0.5
WEIGHT_MSE = 0.5
WEIGHT_TEMPORAL = 0.5
WEIGHT_SMOOTHNESS = 0.5
EPS = 1e-8


def _nan_to_num(x):
    # torch.nan_to_num(x, nan=0.0, posinf=1e6, neginf=-1e6)
    x = jnp.where(jnp.isnan(x), 0.0, x)
    x = jnp.where(x == jnp.inf, 1.0e6, x)
    x = jnp.where(x == -jnp.inf, -1.0e6, x)
    return x


def _combined_loss_kernel(init_img_ref, next_img_ref, init_unclip_ref,
                          pred_ref, out_ref,
                          carry_ref, acc_cos, acc_mse, acc_temp, acc_smooth,
                          *, n_rows, tile_rows, tiles_per_shard):
    c = pl.program_id(0)            # shard (parallel, feeds both TCs on v7x)
    i = pl.program_id(1)            # row tile within shard (arbitrary)
    tn = tile_rows
    start = (c * tiles_per_shard + i) * tile_rows   # global row of this tile

    @pl.when(i == 0)
    def _init():
        acc_cos[...] = jnp.zeros_like(acc_cos)
        acc_mse[...] = jnp.zeros_like(acc_mse)
        acc_temp[...] = jnp.zeros_like(acc_temp)
        acc_smooth[...] = jnp.zeros_like(acc_smooth)

    # Row-validity masks (zero-padded tail rows) which also zero the roll wrap
    # rows, removing the explicit wrap-correction terms entirely.
    k = lax.broadcasted_iota(jnp.int32, (tn, 1), 0)
    g = k + start
    row_m = (g < n_rows).astype(jnp.float32)                          # (T,1)
    d1_m = jnp.logical_and(k < tn - 1, g + 1 < n_rows).astype(jnp.float32)
    dd_m = jnp.logical_and(k < tn - 2, g + 2 < n_rows).astype(jnp.float32)

    # ---- synthetic base_loss_fn, pair 1: init_unclip vs init_img ------------
    # TODO(synk): base_loss_fn is an injected dependency of the PyTorch module;
    # a deterministic cosine-distance / MSE pair loss is used in its place.
    a = init_img_ref[...].astype(jnp.float32)
    u = init_unclip_ref[...].astype(jnp.float32)
    dot_ua = jnp.sum(u * a, axis=-1, keepdims=True)
    na2 = jnp.sum(a * a, axis=-1, keepdims=True)
    nu2 = jnp.sum(u * u, axis=-1, keepdims=True)
    cos_ua = dot_ua * lax.rsqrt(na2 * nu2 + EPS)      # rsqrt -> EUP slot
    e2 = u - a
    # padded rows are zeros in every input -> e2 is zero there, no mask needed
    acc_mse[...] += jnp.sum(e2 * e2, axis=0, keepdims=True)
    # a, u, e2 are dead beyond this point (keeps vreg pressure low)

    # ---- pair 2: pred vs next_img --------------------------------------------
    p = pred_ref[...].astype(jnp.float32)
    b = next_img_ref[...].astype(jnp.float32)
    dot_pb = jnp.sum(p * b, axis=-1, keepdims=True)
    nb2 = jnp.sum(b * b, axis=-1, keepdims=True)
    np2 = jnp.sum(p * p, axis=-1, keepdims=True)
    cos_pb = dot_pb * lax.rsqrt(np2 * nb2 + EPS)
    e1 = p - b
    acc_mse[...] += jnp.sum(e1 * e1, axis=0, keepdims=True)
    acc_cos[...] += jnp.sum(((1.0 - cos_pb) + (1.0 - cos_ua)) * row_m,
                            axis=0, keepdims=True)

    # ---- temporal / smoothness on pred (XLU roll; masks kill wrap + padding) -
    d1 = (pltpu.roll(p, shift=tn - 1, axis=0) - p) * d1_m
    acc_temp[...] += jnp.sum(d1 * d1, axis=0, keepdims=True)
    dd = (pltpu.roll(d1, shift=tn - 1, axis=0) - d1) * dd_m
    acc_smooth[...] += jnp.sum(dd * dd, axis=0, keepdims=True)

    # ---- cross-tile (within-shard) boundary terms from carried last 2 rows ---
    first = p[0:1, :]
    second = p[1:2, :]

    @pl.when(jnp.logical_and(i > 0, start < n_rows))
    def _boundary():
        prev2 = carry_ref[0:1, :]   # second-to-last row of previous tile
        prev1 = carry_ref[1:2, :]   # last row of previous tile
        bt = first - prev1
        bs1 = first - 2.0 * prev1 + prev2
        bs2 = second - 2.0 * first + prev1
        acc_temp[...] += bt * bt
        acc_smooth[...] += bs1 * bs1 + bs2 * bs2

    # update carry AFTER boundary terms
    carry_ref[...] = p[tn - 2:tn, :]

    # ---- per-shard finalize: single cross-lane reduce, emit raw partial sums -
    @pl.when(i == tiles_per_shard - 1)
    def _finalize():
        cos_s = acc_cos[...]
        mse_s = jnp.sum(acc_mse[...], axis=-1, keepdims=True)
        temp_s = jnp.sum(acc_temp[...], axis=-1, keepdims=True)
        smooth_s = jnp.sum(acc_smooth[...], axis=-1, keepdims=True)
        ridx = lax.broadcasted_iota(jnp.int32, (8, 128), 0)
        out_ref[...] = (jnp.where(ridx == 0, cos_s, 0.0)
                        + jnp.where(ridx == 1, mse_s, 0.0)
                        + jnp.where(ridx == 2, temp_s, 0.0)
                        + jnp.where(ridx == 3, smooth_s, 0.0))


def _vmem_capacity_bytes():
    """Physical VMEM per core; conservative 64 MiB fallback (v7x-sized)."""
    try:
        info = pltpu.get_tpu_info()
        cap = getattr(info, "vmem_capacity_bytes", None)
        if cap:
            return int(cap)
    except Exception:
        pass
    return 64 * 1024 * 1024


def _round_up(x, m):
    return ((x + m - 1) // m) * m


def combined_loss(init_img_vec, next_img_vec, init_unclip, pred_unclip,
                  *, tile_rows=None, num_shards=None):
    """All inputs: (N, D) float arrays (f32 or bf16, N % 8 == 0, D % 128 == 0).

    Returns two f32 scalars (combined cos loss, combined mse loss).
    """
    n, d = pred_unclip.shape
    for x in (init_img_vec, next_img_vec, init_unclip):
        assert x.shape == (n, d), "all inputs must share the same (N, D) shape"
    assert n % 8 == 0, "row count must be a multiple of 8"
    assert d % 128 == 0, "feature dim must be a multiple of 128"

    if num_shards is None:
        # 2 shards let v7x stream half the rows per TensorCore; on 1-TC chips
        # the extra shard just runs back-to-back (one extra init/finalize).
        num_shards = 2 if n >= 32 else 1

    itemsize = jnp.dtype(pred_unclip.dtype).itemsize

    # Per-generation budgets: cap the scoped VMEM limit at 3/4 of physical
    # (~48 MiB on v7x, ~96 MiB on v5e/v6e) and give the 4-stream
    # double-buffered input window half of it.
    vmem_phys = _vmem_capacity_bytes()
    vmem_limit = int(max(32 * 1024 * 1024,
                         min(vmem_phys * 3 // 4, 112 * 1024 * 1024)))
    input_budget = vmem_limit // 2

    shard_rows_target = _round_up(-(-n // num_shards), 8)   # ceil, mult of 8
    if tile_rows is None:
        per_row_bytes = 4 * 2 * d * itemsize      # 4 streams x 2 buffers
        cap = max(8, min(2048, input_budget // per_row_bytes))
        cap = (cap // 8) * 8
        tile_rows = max(8, min(cap, shard_rows_target))
    assert tile_rows % 8 == 0 and tile_rows >= 8

    tiles_per_shard = -(-shard_rows_target // tile_rows)
    rows_per_shard = tiles_per_shard * tile_rows
    n_pad = num_shards * rows_per_shard

    def _pad(x):
        if n_pad == n:
            return x
        return jnp.pad(x, ((0, n_pad - n), (0, 0)))   # zero padding; masked

    a_p = _pad(init_img_vec)
    b_p = _pad(next_img_vec)
    u_p = _pad(init_unclip)
    p_p = _pad(pred_unclip)

    kernel = functools.partial(_combined_loss_kernel, n_rows=n,
                               tile_rows=tile_rows,
                               tiles_per_shard=tiles_per_shard)

    row_spec = pl.BlockSpec((tile_rows, d),
                            lambda c, i: (c * tiles_per_shard + i, 0))
    out_spec = pl.BlockSpec((8, 128), lambda c, i: (c, 0))

    grid_spec = pltpu.PrefetchScalarGridSpec(
        num_scalar_prefetch=0,
        grid=(num_shards, tiles_per_shard),
        in_specs=[row_spec, row_spec, row_spec, row_spec],
        out_specs=out_spec,
        scratch_shapes=[
            pltpu.VMEM((2, d), jnp.float32),    # last 2 rows of previous tile
            pltpu.VMEM((1, 1), jnp.float32),    # cosine-term accumulator
            pltpu.VMEM((1, d), jnp.float32),    # mse vector accumulator
            pltpu.VMEM((1, d), jnp.float32),    # temporal vector accumulator
            pltpu.VMEM((1, d), jnp.float32),    # smoothness vector accumulator
        ],
    )

    out = pl.pallas_call(
        kernel,
        out_shape=jax.ShapeDtypeStruct((num_shards * 8, 128), jnp.float32),
        grid_spec=grid_spec,
        compiler_params=pltpu.CompilerParams(
            dimension_semantics=("parallel", "arbitrary"),
            vmem_limit_bytes=vmem_limit),
    )(a_p, b_p, u_p, p_p)

    # ---- tiny wrapper epilogue: combine shards + boundary terms + finalize ---
    parts = out.reshape(num_shards, 8, 128)[:, :4, 0]        # (num_shards, 4)
    cos_sum = jnp.sum(parts[:, 0])
    mse_sum = jnp.sum(parts[:, 1])
    temp_sum = jnp.sum(parts[:, 2])
    smooth_sum = jnp.sum(parts[:, 3])

    # cross-shard boundary temporal / smoothness diffs (a few rows of pred)
    p32 = pred_unclip.astype(jnp.float32)
    for c in range(1, num_shards):
        rb = c * rows_per_shard
        if rb < n:   # static shapes -> Python-level guard
            bt = p32[rb] - p32[rb - 1]
            bs1 = p32[rb] - 2.0 * p32[rb - 1] + p32[rb - 2]
            bs2 = p32[rb + 1] - 2.0 * p32[rb] + p32[rb - 1]
            temp_sum = temp_sum + jnp.sum(bt * bt)
            smooth_sum = smooth_sum + jnp.sum(bs1 * bs1) + jnp.sum(bs2 * bs2)

    nf = float(n)
    df = float(d)
    base_cos = WEIGHT_ROTE * cos_sum / nf
    base_mse = WEIGHT_MSE * mse_sum / (nf * df)
    temporal = temp_sum / ((nf - 1.0) * df)
    smooth = smooth_sum / ((nf - 2.0) * df)
    extra = WEIGHT_TEMPORAL * temporal + WEIGHT_SMOOTHNESS * smooth
    cos_loss = _nan_to_num(base_cos + extra) + EPS
    mse_loss = _nan_to_num(base_mse + extra) + EPS
    return cos_loss, mse_loss


# ---- pure-JAX reference (same synthetic base loss) for self-check -----------
def _reference_combined_loss(init_img_vec, next_img_vec, init_unclip, pred_unclip):
    a = init_img_vec.astype(jnp.float32)
    b = next_img_vec.astype(jnp.float32)
    c = init_unclip.astype(jnp.float32)
    p = pred_unclip.astype(jnp.float32)

    def cos_mean(u, v):
        dot = jnp.sum(u * v, axis=-1)
        nu2 = jnp.sum(u * u, axis=-1)
        nv2 = jnp.sum(v * v, axis=-1)
        return jnp.mean(1.0 - dot * lax.rsqrt(nu2 * nv2 + EPS))

    base_cos = WEIGHT_ROTE * (cos_mean(p, b) + cos_mean(c, a))
    base_mse = WEIGHT_MSE * (jnp.mean((p - b) ** 2) + jnp.mean((c - a) ** 2))
    d1 = p[1:] - p[:-1]
    temporal = jnp.mean(d1 ** 2)
    d2 = d1[1:] - d1[:-1]
    smooth = jnp.mean(d2 ** 2)
    extra = WEIGHT_TEMPORAL * temporal + WEIGHT_SMOOTHNESS * smooth
    return (_nan_to_num(base_cos + extra) + EPS,
            _nan_to_num(base_mse + extra) + EPS)


if __name__ == "__main__":
    key = jax.random.PRNGKey(0)
    keys = jax.random.split(key, 8)

    # Case 1: evenly divisible shapes; tile_rows=16 -> grid (2 shards, 2 tiles)
    # exercising the parallel shard split, the pipelined reduction and the
    # cross-tile / cross-shard temporal-smoothness boundary terms.
    N, D = 64, 256
    init_img_vec = jax.random.normal(keys[0], (N, D), dtype=jnp.float32)
    next_img_vec = jax.random.normal(keys[1], (N, D), dtype=jnp.float32)
    init_unclip = jax.random.normal(keys[2], (N, D), dtype=jnp.float32)
    pred_unclip = jax.random.normal(keys[3], (N, D), dtype=jnp.float32)

    cos_loss, mse_loss = combined_loss(init_img_vec, next_img_vec,
                                       init_unclip, pred_unclip, tile_rows=16)
    jax.block_until_ready((cos_loss, mse_loss))
    ref_cos, ref_mse = _reference_combined_loss(init_img_vec, next_img_vec,
                                                init_unclip, pred_unclip)
    assert np.allclose(np.asarray(cos_loss), np.asarray(ref_cos),
                       rtol=2e-3, atol=1e-5)
    assert np.allclose(np.asarray(mse_loss), np.asarray(ref_mse),
                       rtol=2e-3, atol=1e-5)

    # Case 2: ragged N (no good divisor) -> zero-pad + in-kernel mask path.
    N2, D2 = 40, 128
    a2 = jax.random.normal(keys[4], (N2, D2), dtype=jnp.float32)
    b2 = jax.random.normal(keys[5], (N2, D2), dtype=jnp.float32)
    u2 = jax.random.normal(keys[6], (N2, D2), dtype=jnp.float32)
    p2 = jax.random.normal(keys[7], (N2, D2), dtype=jnp.float32)
    cos2, mse2 = combined_loss(a2, b2, u2, p2)
    jax.block_until_ready((cos2, mse2))
    r_cos2, r_mse2 = _reference_combined_loss(a2, b2, u2, p2)
    assert np.allclose(np.asarray(cos2), np.asarray(r_cos2),
                       rtol=2e-3, atol=1e-5)
    assert np.allclose(np.asarray(mse2), np.asarray(r_mse2),
                       rtol=2e-3, atol=1e-5)

    print("KERNEL_OK")
</pallas_src>

<mosaic_0001>
module attributes {stable_mosaic.version = 11 : i64} {
  func.func @_combined_loss_kernel(%arg0: i32, %arg1: i32, %arg2: memref<16x256xf32, #tpu.memory_space<vmem>>, %arg3: memref<16x256xf32, #tpu.memory_space<vmem>>, %arg4: memref<16x256xf32, #tpu.memory_space<vmem>>, %arg5: memref<16x256xf32, #tpu.memory_space<vmem>>, %arg6: memref<8x128xf32, #tpu.memory_space<vmem>>, %arg7: memref<2x256xf32, #tpu.memory_space<vmem>>, %arg8: memref<1x1xf32, #tpu.memory_space<vmem>>, %arg9: memref<1x256xf32, #tpu.memory_space<vmem>>, %arg10: memref<1x256xf32, #tpu.memory_space<vmem>>, %arg11: memref<1x256xf32, #tpu.memory_space<vmem>>) attributes {dimension_semantics = [#tpu.dimension_semantics<parallel>, #tpu.dimension_semantics<arbitrary>], iteration_bounds = array<i64: 2, 2>, scalar_prefetch = 0 : i64, scratch_operands = 5 : i64, tpu.core_type = #tpu.core_type<tc>, window_params = [{transform_indices = @transform_0, window_bounds = array<i64: 16, 256>}, {transform_indices = @transform_1, window_bounds = array<i64: 16, 256>}, {transform_indices = @transform_2, window_bounds = array<i64: 16, 256>}, {transform_indices = @transform_3, window_bounds = array<i64: 16, 256>}, {transform_indices = @transform_4, window_bounds = array<i64: 8, 128>}]} {
    %c2_i32 = arith.constant 2 : i32
    %0 = arith.muli %arg0, %c2_i32 : i32
    %1 = arith.addi %0, %arg1 : i32
    %c16_i32 = arith.constant 16 : i32
    %2 = arith.muli %1, %c16_i32 : i32
    %c0_i32 = arith.constant 0 : i32
    %3 = arith.cmpi eq, %arg1, %c0_i32 : i32
    %4 = arith.extui %3 : i1 to i32
    %c0_i32_0 = arith.constant 0 : i32
    %5 = arith.cmpi ne, %4, %c0_i32_0 : i32
    scf.if %5 {
      %cst_54 = arith.constant 0.000000e+00 : f32
      %120 = vector.broadcast %cst_54 : f32 to vector<1x1xf32>
      %c0_55 = arith.constant 0 : index
      %c0_56 = arith.constant 0 : index
      %121 = vector.load %arg8[%c0_55, %c0_56] : memref<1x1xf32, #tpu.memory_space<vmem>>, vector<1x1xf32>
      tpu.vector_store %arg8[%c0_55, %c0_56], %120 {strides = array<i32>} : memref<1x1xf32, #tpu.memory_space<vmem>>, vector<1x1xf32>,
      %cst_57 = arith.constant 0.000000e+00 : f32
      %122 = vector.broadcast %cst_57 : f32 to vector<1x256xf32>
      %c0_58 = arith.constant 0 : index
      %c0_59 = arith.constant 0 : index
      %123 = vector.load %arg9[%c0_58, %c0_59] : memref<1x256xf32, #tpu.memory_space<vmem>>, vector<1x256xf32>
      tpu.vector_store %arg9[%c0_58, %c0_59], %122 {strides = array<i32>} : memref<1x256xf32, #tpu.memory_space<vmem>>, vector<1x256xf32>,
      %cst_60 = arith.constant 0.000000e+00 : f32
      %124 = vector.broadcast %cst_60 : f32 to vector<1x256xf32>
      %c0_61 = arith.constant 0 : index
      %c0_62 = arith.constant 0 : index
      %125 = vector.load %arg10[%c0_61, %c0_62] : memref<1x256xf32, #tpu.memory_space<vmem>>, vector<1x256xf32>
      tpu.vector_store %arg10[%c0_61, %c0_62], %124 {strides = array<i32>} : memref<1x256xf32, #tpu.memory_space<vmem>>, vector<1x256xf32>,
      %cst_63 = arith.constant 0.000000e+00 : f32
      %126 = vector.broadcast %cst_63 : f32 to vector<1x256xf32>
      %c0_64 = arith.constant 0 : index
      %c0_65 = arith.constant 0 : index
      %127 = vector.load %arg11[%c0_64, %c0_65] : memref<1x256xf32, #tpu.memory_space<vmem>>, vector<1x256xf32>
      tpu.vector_store %arg11[%c0_64, %c0_65], %126 {strides = array<i32>} : memref<1x256xf32, #tpu.memory_space<vmem>>, vector<1x256xf32>,
    } else {
    }
    %6 = tpu.iota {dimensions = array<i32: 0>} : vector<16x1xi32>
    %7 = vector.broadcast %2 : i32 to vector<16x1xi32>
    %8 = arith.addi %6, %7 : vector<16x1xi32>
    %c64_i32 = arith.constant 64 : i32
    %9 = vector.broadcast %c64_i32 : i32 to vector<16x1xi32>
    %10 = arith.cmpi slt, %8, %9 : vector<16x1xi32>
    %11 = arith.extui %10 : vector<16x1xi1> to vector<16x1xi32>
    %12 = arith.sitofp %11 : vector<16x1xi32> to vector<16x1xf32>
    %c15_i32 = arith.constant 15 : i32
    %13 = vector.broadcast %c15_i32 : i32 to vector<16x1xi32>
    %14 = arith.cmpi slt, %6, %13 : vector<16x1xi32>
    %c1_i32 = arith.constant 1 : i32
    %15 = vector.broadcast %c1_i32 : i32 to vector<16x1xi32>
    %16 = arith.addi %8, %15 : vector<16x1xi32>
    %c64_i32_1 = arith.constant 64 : i32
    %17 = vector.broadcast %c64_i32_1 : i32 to vector<16x1xi32>
    %18 = arith.cmpi slt, %16, %17 : vector<16x1xi32>
    %19 = arith.andi %14, %18 : vector<16x1xi1>
    %20 = arith.extui %19 : vector<16x1xi1> to vector<16x1xi32>
    %21 = arith.sitofp %20 : vector<16x1xi32> to vector<16x1xf32>
    %c14_i32 = arith.constant 14 : i32
    %22 = vector.broadcast %c14_i32 : i32 to vector<16x1xi32>
    %23 = arith.cmpi slt, %6, %22 : vector<16x1xi32>
    %c2_i32_2 = arith.constant 2 : i32
    %24 = vector.broadcast %c2_i32_2 : i32 to vector<16x1xi32>
    %25 = arith.addi %8, %24 : vector<16x1xi32>
    %c64_i32_3 = arith.constant 64 : i32
    %26 = vector.broadcast %c64_i32_3 : i32 to vector<16x1xi32>
    %27 = arith.cmpi slt, %25, %26 : vector<16x1xi32>
    %28 = arith.andi %23, %27 : vector<16x1xi1>
    %29 = arith.extui %28 : vector<16x1xi1> to vector<16x1xi32>
    %30 = arith.sitofp %29 : vector<16x1xi32> to vector<16x1xf32>
    %c0 = arith.constant 0 : index
    %c0_4 = arith.constant 0 : index
    %31 = vector.load %arg2[%c0, %c0_4] : memref<16x256xf32, #tpu.memory_space<vmem>>, vector<16x256xf32>
    %c0_5 = arith.constant 0 : index
    %c0_6 = arith.constant 0 : index
    %32 = vector.load %arg4[%c0_5, %c0_6] : memref<16x256xf32, #tpu.memory_space<vmem>>, vector<16x256xf32>
    %33 = arith.mulf %32, %31 : vector<16x256xf32>
    %cst = arith.constant dense<0.000000e+00> : vector<16xf32>
    %34 = vector.multi_reduction <add>, %33, %cst [1] : vector<16x256xf32> to vector<16xf32>
    %35 = vector.shape_cast %34 : vector<16xf32> to vector<16x1xf32>
    %36 = arith.mulf %31, %31 : vector<16x256xf32>
    %cst_7 = arith.constant dense<0.000000e+00> : vector<16xf32>
    %37 = vector.multi_reduction <add>, %36, %cst_7 [1] : vector<16x256xf32> to vector<16xf32>
    %38 = vector.shape_cast %37 : vector<16xf32> to vector<16x1xf32>
    %39 = arith.mulf %32, %32 : vector<16x256xf32>
    %cst_8 = arith.constant dense<0.000000e+00> : vector<16xf32>
    %40 = vector.multi_reduction <add>, %39, %cst_8 [1] : vector<16x256xf32> to vector<16xf32>
    %41 = vector.shape_cast %40 : vector<16xf32> to vector<16x1xf32>
    %42 = arith.mulf %38, %41 : vector<16x1xf32>
    %cst_9 = arith.constant 9.99999993E-9 : f32
    %43 = vector.broadcast %cst_9 : f32 to vector<16x1xf32>
    %44 = arith.addf %42, %43 : vector<16x1xf32>
    %45 = math.rsqrt %44 : vector<16x1xf32>
    %46 = arith.mulf %35, %45 : vector<16x1xf32>
    %47 = arith.subf %32, %31 : vector<16x256xf32>
    %c0_10 = arith.constant 0 : index
    %c0_11 = arith.constant 0 : index
    %48 = vector.load %arg9[%c0_10, %c0_11] : memref<1x256xf32, #tpu.memory_space<vmem>>, vector<1x256xf32>
    %49 = arith.mulf %47, %47 : vector<16x256xf32>
    %cst_12 = arith.constant dense<0.000000e+00> : vector<256xf32>
    %50 = vector.multi_reduction <add>, %49, %cst_12 [0] : vector<16x256xf32> to vector<256xf32>
    %51 = vector.shape_cast %50 : vector<256xf32> to vector<1x256xf32>
    %52 = arith.addf %48, %51 : vector<1x256xf32>
    %c0_13 = arith.constant 0 : index
    %c0_14 = arith.constant 0 : index
    %53 = vector.load %arg9[%c0_13, %c0_14] : memref<1x256xf32, #tpu.memory_space<vmem>>, vector<1x256xf32>
    tpu.vector_store %arg9[%c0_13, %c0_14], %52 {strides = array<i32>} : memref<1x256xf32, #tpu.memory_space<vmem>>, vector<1x256xf32>,
    %c0_15 = arith.constant 0 : index
    %c0_16 = arith.constant 0 : index
    %54 = vector.load %arg5[%c0_15, %c0_16] : memref<16x256xf32, #tpu.memory_space<vmem>>, vector<16x256xf32>
    %c0_17 = arith.constant 0 : index
    %c0_18 = arith.constant 0 : index
    %55 = vector.load %arg3[%c0_17, %c0_18] : memref<16x256xf32, #tpu.memory_space<vmem>>, vector<16x256xf32>
    %56 = arith.mulf %54, %55 : vector<16x256xf32>
    %cst_19 = arith.constant dense<0.000000e+00> : vector<16xf32>
    %57 = vector.multi_reduction <add>, %56, %cst_19 [1] : vector<16x256xf32> to vector<16xf32>
    %58 = vector.shape_cast %57 : vector<16xf32> to vector<16x1xf32>
    %59 = arith.mulf %55, %55 : vector<16x256xf32>
    %cst_20 = arith.constant dense<0.000000e+00> : vector<16xf32>
    %60 = vector.multi_reduction <add>, %59, %cst_20 [1] : vector<16x256xf32> to vector<16xf32>
    %61 = vector.shape_cast %60 : vector<16xf32> to vector<16x1xf32>
    %62 = arith.mulf %54, %54 : vector<16x256xf32>
    %cst_21 = arith.constant dense<0.000000e+00> : vector<16xf32>
    %63 = vector.multi_reduction <add>, %62, %cst_21 [1] : vector<16x256xf32> to vector<16xf32>
    %64 = vector.shape_cast %63 : vector<16xf32> to vector<16x1xf32>
    %65 = arith.mulf %64, %61 : vector<16x1xf32>
    %cst_22 = arith.constant 9.99999993E-9 : f32
    %66 = vector.broadcast %cst_22 : f32 to vector<16x1xf32>
    %67 = arith.addf %65, %66 : vector<16x1xf32>
    %68 = math.rsqrt %67 : vector<16x1xf32>
    %69 = arith.mulf %58, %68 : vector<16x1xf32>
    %70 = arith.subf %54, %55 : vector<16x256xf32>
    %c0_23 = arith.constant 0 : index
    %c0_24 = arith.constant 0 : index
    %71 = vector.load %arg9[%c0_23, %c0_24] : memref<1x256xf32, #tpu.memory_space<vmem>>, vector<1x256xf32>
    %72 = arith.mulf %70, %70 : vector<16x256xf32>
    %cst_25 = arith.constant dense<0.000000e+00> : vector<256xf32>
    %73 = vector.multi_reduction <add>, %72, %cst_25 [0] : vector<16x256xf32> to vector<256xf32>
    %74 = vector.shape_cast %73 : vector<256xf32> to vector<1x256xf32>
    %75 = arith.addf %71, %74 : vector<1x256xf32>
    %c0_26 = arith.constant 0 : index
    %c0_27 = arith.constant 0 : index
    %76 = vector.load %arg9[%c0_26, %c0_27] : memref<1x256xf32, #tpu.memory_space<vmem>>, vector<1x256xf32>
    tpu.vector_store %arg9[%c0_26, %c0_27], %75 {strides = array<i32>} : memref<1x256xf32, #tpu.memory_space<vmem>>, vector<1x256xf32>,
    %c0_28 = arith.constant 0 : index
    %c0_29 = arith.constant 0 : index
    %77 = vector.load %arg8[%c0_28, %c0_29] : memref<1x1xf32, #tpu.memory_space<vmem>>, vector<1x1xf32>
    %cst_30 = arith.constant 1.000000e+00 : f32
    %78 = vector.broadcast %cst_30 : f32 to vector<16x1xf32>
    %79 = arith.subf %78, %69 : vector<16x1xf32>
    %cst_31 = arith.constant 1.000000e+00 : f32
    %80 = vector.broadcast %cst_31 : f32 to vector<16x1xf32>
    %81 = arith.subf %80, %46 : vector<16x1xf32>
    %82 = arith.addf %79, %81 : vector<16x1xf32>
    %83 = arith.mulf %82, %12 : vector<16x1xf32>
    %cst_32 = arith.constant dense<0.000000e+00> : vector<1xf32>
    %84 = vector.multi_reduction <add>, %83, %cst_32 [0] : vector<16x1xf32> to vector<1xf32>
    %85 = vector.shape_cast %84 : vector<1xf32> to vector<1x1xf32>
    %86 = arith.addf %77, %85 : vector<1x1xf32>
    %c0_33 = arith.constant 0 : index
    %c0_34 = arith.constant 0 : index
    %87 = vector.load %arg8[%c0_33, %c0_34] : memref<1x1xf32, #tpu.memory_space<vmem>>, vector<1x1xf32>
    tpu.vector_store %arg8[%c0_33, %c0_34], %86 {strides = array<i32>} : memref<1x1xf32, #tpu.memory_space<vmem>>, vector<1x1xf32>,
    %c15_i32_35 = arith.constant 15 : i32
    %88 = tpu.dynamic_rotate %54 by %c15_i32_35 dim 0 : vector<16x256xf32>, i32 -> vector<16x256xf32>
    %89 = arith.subf %88, %54 : vector<16x256xf32>
    %90 = vector.broadcast %21 : vector<16x1xf32> to vector<16x256xf32>
    %91 = arith.mulf %89, %90 : vector<16x256xf32>
    %c0_36 = arith.constant 0 : index
    %c0_37 = arith.constant 0 : index
    %92 = vector.load %arg10[%c0_36, %c0_37] : memref<1x256xf32, #tpu.memory_space<vmem>>, vector<1x256xf32>
    %93 = arith.mulf %91, %91 : vector<16x256xf32>
    %cst_38 = arith.constant dense<0.000000e+00> : vector<256xf32>
    %94 = vector.multi_reduction <add>, %93, %cst_38 [0] : vector<16x256xf32> to vector<256xf32>
    %95 = vector.shape_cast %94 : vector<256xf32> to vector<1x256xf32>
    %96 = arith.addf %92, %95 : vector<1x256xf32>
    %c0_39 = arith.constant 0 : index
    %c0_40 = arith.constant 0 : index
    %97 = vector.load %arg10[%c0_39, %c0_40] : memref<1x256xf32, #tpu.memory_space<vmem>>, vector<1x256xf32>
    tpu.vector_store %arg10[%c0_39, %c0_40], %96 {strides = array<i32>} : memref<1x256xf32, #tpu.memory_space<vmem>>, vector<1x256xf32>,
    %c15_i32_41 = arith.constant 15 : i32
    %98 = tpu.dynamic_rotate %91 by %c15_i32_41 dim 0 : vector<16x256xf32>, i32 -> vector<16x256xf32>
    %99 = arith.subf %98, %91 : vector<16x256xf32>
    %100 = vector.broadcast %30 : vector<16x1xf32> to vector<16x256xf32>
    %101 = arith.mulf %99, %100 : vector<16x256xf32>
    %c0_42 = arith.constant 0 : index
    %c0_43 = arith.constant 0 : index
    %102 = vector.load %arg11[%c0_42, %c0_43] : memref<1x256xf32, #tpu.memory_space<vmem>>, vector<1x256xf32>
    %103 = arith.mulf %101, %101 : vector<16x256xf32>
    %cst_44 = arith.constant dense<0.000000e+00> : vector<256xf32>
    %104 = vector.multi_reduction <add>, %103, %cst_44 [0] : vector<16x256xf32> to vector<256xf32>
    %105 = vector.shape_cast %104 : vector<256xf32> to vector<1x256xf32>
    %106 = arith.addf %102, %105 : vector<1x256xf32>
    %c0_45 = arith.constant 0 : index
    %c0_46 = arith.constant 0 : index
    %107 = vector.load %arg11[%c0_45, %c0_46] : memref<1x256xf32, #tpu.memory_space<vmem>>, vector<1x256xf32>
    tpu.vector_store %arg11[%c0_45, %c0_46], %106 {strides = array<i32>} : memref<1x256xf32, #tpu.memory_space<vmem>>, vector<1x256xf32>,
    %108 = vector.extract_strided_slice %54 {offsets = [0, 0], sizes = [1, 256], strides = [1, 1]} : vector<16x256xf32> to vector<1x256xf32>
    %109 = vector.extract_strided_slice %54 {offsets = [1, 0], sizes = [1, 256], strides = [1, 1]} : vector<16x256xf32> to vector<1x256xf32>
    %c0_i32_47 = arith.constant 0 : i32
    %110 = arith.cmpi sgt, %arg1, %c0_i32_47 : i32
    %c64_i32_48 = arith.constant 64 : i32
    %111 = arith.cmpi slt, %2, %c64_i32_48 : i32
    %112 = arith.andi %110, %111 : i1
    %113 = arith.extui %112 : i1 to i32
    %c0_i32_49 = arith.constant 0 : i32
    %114 = arith.cmpi ne, %113, %c0_i32_49 : i32
    scf.if %114 {
      %c0_54 = arith.constant 0 : index
      %c0_55 = arith.constant 0 : index
      %120 = vector.load %arg7[%c0_54, %c0_55] : memref<2x256xf32, #tpu.memory_space<vmem>>, vector<1x256xf32>
      %c1 = arith.constant 1 : index
      %c0_56 = arith.constant 0 : index
      %121 = vector.load %arg7[%c1, %c0_56] : memref<2x256xf32, #tpu.memory_space<vmem>>, vector<1x256xf32>
      %122 = arith.subf %108, %121 : vector<1x256xf32>
      %cst_57 = arith.constant 2.000000e+00 : f32
      %123 = vector.broadcast %cst_57 : f32 to vector<1x256xf32>
      %124 = arith.mulf %123, %121 : vector<1x256xf32>
      %125 = arith.subf %108, %124 : vector<1x256xf32>
      %126 = arith.addf %125, %120 : vector<1x256xf32>
      %cst_58 = arith.constant 2.000000e+00 : f32
      %127 = vector.broadcast %cst_58 : f32 to vector<1x256xf32>
      %128 = arith.mulf %127, %108 : vector<1x256xf32>
      %129 = arith.subf %109, %128 : vector<1x256xf32>
      %130 = arith.addf %129, %121 : vector<1x256xf32>
      %c0_59 = arith.constant 0 : index
      %c0_60 = arith.constant 0 : index
      %131 = vector.load %arg10[%c0_59, %c0_60] : memref<1x256xf32, #tpu.memory_space<vmem>>, vector<1x256xf32>
      %132 = arith.mulf %122, %122 : vector<1x256xf32>
      %133 = arith.addf %131, %132 : vector<1x256xf32>
      %c0_61 = arith.constant 0 : index
      %c0_62 = arith.constant 0 : index
      %134 = vector.load %arg10[%c0_61, %c0_62] : memref<1x256xf32, #tpu.memory_space<vmem>>, vector<1x256xf32>
      tpu.vector_store %arg10[%c0_61, %c0_62], %133 {strides = array<i32>} : memref<1x256xf32, #tpu.memory_space<vmem>>, vector<1x256xf32>,
      %c0_63 = arith.constant 0 : index
      %c0_64 = arith.constant 0 : index
      %135 = vector.load %arg11[%c0_63, %c0_64] : memref<1x256xf32, #tpu.memory_space<vmem>>, vector<1x256xf32>
      %136 = arith.mulf %126, %126 : vector<1x256xf32>
      %137 = arith.mulf %130, %130 : vector<1x256xf32>
      %138 = arith.addf %136, %137 : vector<1x256xf32>
      %139 = arith.addf %135, %138 : vector<1x256xf32>
      %c0_65 = arith.constant 0 : index
      %c0_66 = arith.constant 0 : index
      %140 = vector.load %arg11[%c0_65, %c0_66] : memref<1x256xf32, #tpu.memory_space<vmem>>, vector<1x256xf32>
      tpu.vector_store %arg11[%c0_65, %c0_66], %139 {strides = array<i32>} : memref<1x256xf32, #tpu.memory_space<vmem>>, vector<1x256xf32>,
    } else {
    }
    %115 = vector.extract_strided_slice %54 {offsets = [14, 0], sizes = [2, 256], strides = [1, 1]} : vector<16x256xf32> to vector<2x256xf32>
    %c0_50 = arith.constant 0 : index
    %c0_51 = arith.constant 0 : index
    %116 = vector.load %arg7[%c0_50, %c0_51] : memref<2x256xf32, #tpu.memory_space<vmem>>, vector<2x256xf32>
    tpu.vector_store %arg7[%c0_50, %c0_51], %115 {strides = array<i32>} : memref<2x256xf32, #tpu.memory_space<vmem>>, vector<2x256xf32>,
    %c1_i32_52 = arith.constant 1 : i32
    %117 = arith.cmpi eq, %arg1, %c1_i32_52 : i32
    %118 = arith.extui %117 : i1 to i32
    %c0_i32_53 = arith.constant 0 : i32
    %119 = arith.cmpi ne, %118, %c0_i32_53 : i32
    scf.if %119 {
      %c0_54 = arith.constant 0 : index
      %c0_55 = arith.constant 0 : index
      %120 = vector.load %arg8[%c0_54, %c0_55] : memref<1x1xf32, #tpu.memory_space<vmem>>, vector<1x1xf32>
      %c0_56 = arith.constant 0 : index
      %c0_57 = arith.constant 0 : index
      %121 = vector.load %arg9[%c0_56, %c0_57] : memref<1x256xf32, #tpu.memory_space<vmem>>, vector<1x256xf32>
      %cst_58 = arith.constant dense<0.000000e+00> : vector<1xf32>
      %122 = vector.multi_reduction <add>, %121, %cst_58 [1] : vector<1x256xf32> to vector<1xf32>
      %123 = vector.shape_cast %122 : vector<1xf32> to vector<1x1xf32>
      %c0_59 = arith.constant 0 : index
      %c0_60 = arith.constant 0 : index
      %124 = vector.load %arg10[%c0_59, %c0_60] : memref<1x256xf32, #tpu.memory_space<vmem>>, vector<1x256xf32>
      %cst_61 = arith.constant dense<0.000000e+00> : vector<1xf32>
      %125 = vector.multi_reduction <add>, %124, %cst_61 [1] : vector<1x256xf32> to vector<1xf32>
      %126 = vector.shape_cast %125 : vector<1xf32> to vector<1x1xf32>
      %c0_62 = arith.constant 0 : index
      %c0_63 = arith.constant 0 : index
      %127 = vector.load %arg11[%c0_62, %c0_63] : memref<1x256xf32, #tpu.memory_space<vmem>>, vector<1x256xf32>
      %cst_64 = arith.constant dense<0.000000e+00> : vector<1xf32>
      %128 = vector.multi_reduction <add>, %127, %cst_64 [1] : vector<1x256xf32> to vector<1xf32>
      %129 = vector.shape_cast %128 : vector<1xf32> to vector<1x1xf32>
      %130 = tpu.iota {dimensions = array<i32: 0>} : vector<8x128xi32>
      %c0_i32_65 = arith.constant 0 : i32
      %131 = vector.broadcast %c0_i32_65 : i32 to vector<8x128xi32>
      %132 = arith.cmpi eq, %130, %131 : vector<8x128xi32>
      %cst_66 = arith.constant 0.000000e+00 : f32
      %133 = vector.shape_cast %120 : vector<1x1xf32> to vector<1x1xf32>
      %134 = vector.broadcast %133 : vector<1x1xf32> to vector<8x128xf32>
      %135 = vector.broadcast %cst_66 : f32 to vector<8x128xf32>
      %136 = arith.select %132, %134, %135 : vector<8x128xi1>, vector<8x128xf32>
      %c1_i32_67 = arith.constant 1 : i32
      %137 = vector.broadcast %c1_i32_67 : i32 to vector<8x128xi32>
      %138 = arith.cmpi eq, %130, %137 : vector<8x128xi32>
      %cst_68 = arith.constant 0.000000e+00 : f32
      %139 = vector.shape_cast %123 : vector<1x1xf32> to vector<1x1xf32>
      %140 = vector.broadcast %139 : vector<1x1xf32> to vector<8x128xf32>
      %141 = vector.broadcast %cst_68 : f32 to vector<8x128xf32>
      %142 = arith.select %138, %140, %141 : vector<8x128xi1>, vector<8x128xf32>
      %143 = arith.addf %136, %142 : vector<8x128xf32>
      %c2_i32_69 = arith.constant 2 : i32
      %144 = vector.broadcast %c2_i32_69 : i32 to vector<8x128xi32>
      %145 = arith.cmpi eq, %130, %144 : vector<8x128xi32>
      %cst_70 = arith.constant 0.000000e+00 : f32
      %146 = vector.shape_cast %126 : vector<1x1xf32> to vector<1x1xf32>
      %147 = vector.broadcast %146 : vector<1x1xf32> to vector<8x128xf32>
      %148 = vector.broadcast %cst_70 : f32 to vector<8x128xf32>
      %149 = arith.select %145, %147, %148 : vector<8x128xi1>, vector<8x128xf32>
      %150 = arith.addf %143, %149 : vector<8x128xf32>
      %c3_i32 = arith.constant 3 : i32
      %151 = vector.broadcast %c3_i32 : i32 to vector<8x128xi32>
      %152 = arith.cmpi eq, %130, %151 : vector<8x128xi32>
      %cst_71 = arith.constant 0.000000e+00 : f32
      %153 = vector.shape_cast %129 : vector<1x1xf32> to vector<1x1xf32>
      %154 = vector.broadcast %153 : vector<1x1xf32> to vector<8x128xf32>
      %155 = vector.broadcast %cst_71 : f32 to vector<8x128xf32>
      %156 = arith.select %152, %154, %155 : vector<8x128xi1>, vector<8x128xf32>
      %157 = arith.addf %150, %156 : vector<8x128xf32>
      %c0_72 = arith.constant 0 : index
      %c0_73 = arith.constant 0 : index
      %158 = vector.load %arg6[%c0_72, %c0_73] : memref<8x128xf32, #tpu.memory_space<vmem>>, vector<8x128xf32>
      tpu.vector_store %arg6[%c0_72, %c0_73], %157 {strides = array<i32>} : memref<8x128xf32, #tpu.memory_space<vmem>>, vector<8x128xf32>,
    } else {
    }
    return
  }
  func.func @transform_0(%arg0: i32, %arg1: i32) -> (i32, i32) {
    %c2_i32 = arith.constant 2 : i32
    %0 = arith.muli %arg0, %c2_i32 : i32
    %1 = arith.addi %0, %arg1 : i32
    %c0_i32 = arith.constant 0 : i32
    %c0_i32_0 = arith.constant 0 : i32
    return %1, %c0_i32 : i32, i32
  }
  func.func @transform_1(%arg0: i32, %arg1: i32) -> (i32, i32) {
    %c2_i32 = arith.constant 2 : i32
    %0 = arith.muli %arg0, %c2_i32 : i32
    %1 = arith.addi %0, %arg1 : i32
    %c0_i32 = arith.constant 0 : i32
    %c0_i32_0 = arith.constant 0 : i32
    return %1, %c0_i32 : i32, i32
  }
  func.func @transform_2(%arg0: i32, %arg1: i32) -> (i32, i32) {
    %c2_i32 = arith.constant 2 : i32
    %0 = arith.muli %arg0, %c2_i32 : i32
    %1 = arith.addi %0, %arg1 : i32
    %c0_i32 = arith.constant 0 : i32
    %c0_i32_0 = arith.constant 0 : i32
    return %1, %c0_i32 : i32, i32
  }
  func.func @transform_3(%arg0: i32, %arg1: i32) -> (i32, i32) {
    %c2_i32 = arith.constant 2 : i32
    %0 = arith.muli %arg0, %c2_i32 : i32
    %1 = arith.addi %0, %arg1 : i32
    %c0_i32 = arith.constant 0 : i32
    %c0_i32_0 = arith.constant 0 : i32
    return %1, %c0_i32 : i32, i32
  }
  func.func @transform_4(%arg0: i32, %arg1: i32) -> (i32, i32) {
    %c0_i32 = arith.constant 0 : i32
    %c0_i32_0 = arith.constant 0 : i32
    return %arg0, %c0_i32 : i32, i32
  }
}

</mosaic_0001>

<bundles_post_ra>
// kernel: tpu_custom_call.1
= control target key start
LH: loop header
LB: loop body
LE: loop exit
PB: predicated region body
PF: predicated region fallthrough
CT: control target
= control target key end

     0   :  { %s2114_s0 = inlined_call_operand.hbm [shape: f32[64,256], index: 0, kind: input, shape index: {}]   ;;  %s2115_s1 = inlined_call_operand.hbm [shape: f32[64,256], index: 1, kind: input, shape index: {}]   ;;  %s2116_s2 = inlined_call_operand.hbm [shape: f32[64,256], index: 2, kind: input, shape index: {}]   ;;  %s2117_s3 = inlined_call_operand.hbm [shape: f32[64,256], index: 3, kind: input, shape index: {}]   ;;  %s2118_s4 = inlined_call_operand.hbm [shape: f32[16,128], index: 4, kind: output, shape index: {}]  }
   0x1   :  { %2129 = sst [smem:[#allocation30_spill]] %s2114_s0 }
   0x2   :  { %2130 = sst [smem:[#allocation31_spill]] %s2115_s1 }
   0x3   :  { %9 = vsyncpa [#allocation8], 0 }
   0x4   :  { %11 = vsyncpa [#allocation8 + $0x1], 0 }
   0x5   :  { %12 = vsyncpa [#allocation11], 0 }
   0x6   :  { %14 = vsyncpa [#allocation11 + $0x1], 0 }
   0x7   :  { %15 = vsyncpa [#allocation14], 0 }
   0x8   :  { %17 = vsyncpa [#allocation14 + $0x1], 0 }
   0x9   :  { %18 = vsyncpa [#allocation9], 0 }
   0xa   :  { %20 = vsyncpa [#allocation9 + $0x1], 0  ;;  %s1612_s15 = smov 0   ;;  %s1614_s16 = smov 0  }
   0xb   :  { %s1616_s17 = smov 0   ;;  %s1618_s18 = smov 0  }
   0xc   :  { %s1620_s19 = smov 0   ;;  %s1622_s20 = smov 0  }
   0xd   :  { %s1624_s21 = smov 0   ;;  %s1626_s22 = smov 0  }
   0xe   :  { %s1628_s23 = smov 0   ;;  %s1630_s24 = smov 0  }
   0xf   :  { %s1632_s25 = smov 0  }
  0x10 LB: > { %2131 = sst [smem:[#allocation20_spill]] %s1533_s15  ;;  %s1666_s26 = sadd.s32 4294967295, %s1573_s25   ;;  %s1573_s25 = sphi %s1632_s25, %s26_s25   ;;  %s1569_s24 = sphi %s1630_s24, %s2162_s24   ;;  %s1565_s23 = sphi %s1628_s23, %s2161_s23   ;;  %s1561_s22 = sphi %s1626_s22, %s2160_s22   ;;  %s1557_s21 = sphi %s1624_s21, %s2159_s21   ;;  %s1553_s20 = sphi %s1622_s20, %s2158_s20   ;;  %s1549_s19 = sphi %s1620_s19, %s2166_s19   ;;  %s1545_s18 = sphi %s1618_s18, %s2165_s18   ;;  %s1541_s17 = sphi %s1616_s17, %s2156_s17   ;;  %s1537_s16 = sphi %s1614_s16, %s2164_s16   ;;  %s1533_s15 = sphi %s1612_s15, %s2163_s15  }
  0x11   : > { %2132 = sst [smem:[#allocation21_spill]] %s1541_s17  ;;  %s1139_s27 = sadd.s32 4294967294, %s1573_s25  }
  0x12   : > { %2133 = sst [smem:[#allocation22_spill]] %s1553_s20  ;;  %s35_s28 = sadd.s32 1, %s1565_s23 }
  0x13   : > { %2134 = sst [smem:[#allocation23_spill]] %s1565_s23  ;;  %s38_s29 = sadd.s32 1, %s1569_s24 }
  0x14   : > { %2135 = sst [smem:[#allocation24_spill]] %s1569_s24  ;;  %p36_p0 = scmp.ge.s32.totalorder %s35_s28, 2 }
  0x15   : > { %s1140_s30 = sshll.u32 %s1569_s24, 1  ;;  %s49_s6 = sadd.s32 1, %s1553_s20 }
  0x16   : > { %s1673_s5 = sadd.s32 %s1565_s23, %s1140_s30  ;;  %s2168_s28 = smov (%p36_p0, %s35_s28), 0 }
  0x17   : > { %2136 = sst [smem:[#allocation25_spill]] %s2168_s28  ;;  %s2170_s29 = smov (!%p36_p0, %s38_s29), %s1569_s24 }
  0x18   : > { %p56_p1 = scmp.ne.s32.totalorder %s1553_s20, %s1549_s19  ;;  %p57_p2 = scmp.eq.s32.totalorder %s1573_s25, 0 }
  0x19   : > { %p40_p3 = scmp.ge.s32.totalorder %s2170_s29, 2  ;;  %p62_p4 = scmp.ne.s32.totalorder %s1549_s19, %s1545_s18 }
  0x1a   : > { %p1683_p5 = por %p57_p2, %p56_p1  ;;  %p63_p6 = scmp.eq.s32.totalorder %s1666_s26, 0 }
  0x1b   : > { %s2172_s29 = smov (%p40_p3, %s2170_s29), 0  ;;  %s165_s9 = sadd.s32 1, %s1541_s17 }
  0x1c   : > { %2138 = sst [smem:[#allocation26_spill]] %s2172_s29  ;;  %p1690_p7 = por %p63_p6, %p62_p4 }
  0x1d   : > { %s1141_s10 = sshll.u32 %s2172_s29, 1  ;;  %s162_s11 = ssub.s32 %s1569_s24, %s2172_s29 }
  0x1e   : > { %s45_s12 = sadd.s32 %s1141_s10, %s2168_s28  ;;  %p163_p8 = scmp.eq.s32.totalorder %s162_s11, 0 }
  0x1f   : > { %s46_s13 = ssub.s32 %s1673_s5, %s45_s12  ;;  %p175_p9 = scmp.ne.s32.totalorder %s1541_s17, %s1537_s16 }
  0x20   : > { %p47_p10 = scmp.eq.s32.totalorder %s46_s13, 0  ;;  %p176_p11 = scmp.eq.s32.totalorder %s1666_s26, 3 }
  0x21   : > { %s1704_s14 = scalar_select %p163_p8, %s1541_s17, %s165_s9  }
  0x22   : > { %s1707_s18 = scalar_select %p47_p10, %s1553_s20, %s49_s6  }
  0x23   : > { %2140 = sst [smem:[#allocation27_spill]] %s1704_s14  ;;  %p1709_p12 = por %p176_p11, %p175_p9 }
  0x24   : > { %2141 = sst [smem:[#allocation28_spill]] %s1707_s18  ;;  %p181_p13 = scmp.ne.s32.totalorder %s1537_s16, %s1533_s15 }
  0x25   : > { %p182_p0 = scmp.eq.s32.totalorder %s1139_s27, 3  ;;  %p1226_p1 = scmp.lt.s32.totalorder %s1573_s25, 4 }
  0x26   : > { %s1719_s10 = sand.u32 1, %s1553_s20   ;;  %s1729_s6 = sshll.u32 %s1673_s5, 9 }
  0x27   : > { %p1721_p2 = por %p182_p0, %p181_p13  ;;  %s1726_s9 = sshll.u32 %s1719_s10, 5 }
  0x28   : > { %p1733_p3 = pnand %p1226_p1, %p1683_p5  ;;  %s226_s27 = sand.u32 1, %s1573_s25  }
  0x29   : > { %s2143_s11 = scalar_select %p1721_p2, 1, 0 }
  0x2a   : > { %s2146_s1 = sld [smem:[#allocation31_spill]]  ;;  %s230_s24 = scalar_lea.vmem [#allocation10], %s1726_s9 }
  0x2b   : > { %2144 = sst [smem:[#allocation29_spill]] %s2143_s11  ;;  %s240_s23 = sshll.u32 %s230_s24, 4  ;;  %s241_s23 = int_to_ptr.vmem [resolvable:$true] %s240_s23 }
  0x2c   : > { %p1170_p4 = scmp.ge.s32.totalorder %s1573_s25, 1  ;;  %s1744_s18 = scalar_lea.sflag [#allocation11], %s226_s27 }
  0x2d   : > { %p1335_p6 = pneg %p1733_p3  ;;  %s1346_s5 = scalar_lea.vmem %s241_s23, 512 }
  0x2e   : > { %p1347_p5 = scmp.ne.s32.totalorder %s241_s23, %s1346_s5  ;;  %s1575_s7 = smov [#allocation10]  }
  0x2f   : > { %s1351_s20 = sshll.u32 %s1575_s7, 4  ;;  %s1352_s20 = int_to_ptr.vmem [resolvable:$false] %s1351_s20 }
  0x30   : > { %s239_s28 = scalar_lea.hbm %s2146_s1, %s1729_s6  ;;  %p1349_p8 = pnand %p1347_p5, %p1335_p6 }
  0x31   : > { %s1353_s14 = scalar_lea.vmem %s1352_s20, 1024  ;;  %p1354_p10 = scmp.lt.s32.totalorder %s241_s23, %s1352_s20 }
  0x32   : > { %p1350_p9 = pneg %p1349_p8  ;;  %p1355_p11 = scmp.lt.s32.totalorder %s1353_s14, %s1346_s5 }
  0x34   : > { %p1356_p13 = por %p1355_p11, %p1354_p10 }
  0x36   : > { %p1357_p0 = pnand %p1356_p13, %p1350_p9 }
  0x38   : > { %1360 = shalt.err (!%p1357_p0)
}
  0x39   : > { %s2125_s24 = smov 256   ;;  %s1577_s29 = smov 16  }
  0x3a   : > { %1215 = dma.hbm_to_vmem [thread:$0]  (!%p1733_p3), %s239_s28, 512, %s241_s23, %s1744_s18, %s2125_s24, %s2125_s24, %s1577_s29  }
  0x3b   : > { %p296_p1 = scmp.lt.s32.totalorder %s1573_s25, 5  ;;  %s2148_s0 = sld [smem:[#allocation30_spill]] }
  0x3c   : > { %s206_s5 = scalar_lea.vmem [#allocation7], %s1726_s9  ;;  %s203_s1 = scalar_lea.sflag [#allocation8], %s1719_s10 }
  0x3d   : > { %p1760_p5 = pnand %p1170_p4, %p296_p1  ;;  %s216_s7 = sshll.u32 %s206_s5, 4  ;;  %s217_s7 = int_to_ptr.vmem [resolvable:$true] %s216_s7 }
  0x3e   : > { %s1374_s17 = scalar_lea.vmem %s217_s7, 512  ;;  %s1578_s23 = smov [#allocation7]  }
  0x3f   : > { %p1375_p8 = scmp.ne.s32.totalorder %s217_s7, %s1374_s17  ;;  %s1379_s28 = sshll.u32 %s1578_s23, 4  ;;  %s1380_s28 = int_to_ptr.vmem [resolvable:$false] %s1379_s28 }
  0x40   : > { %s1381_s24 = scalar_lea.vmem %s1380_s28, 1024  ;;  %p1382_p4 = scmp.lt.s32.totalorder %s217_s7, %s1380_s28 }
  0x41   : > { %s215_s13 = scalar_lea.hbm %s2148_s0, %s1729_s6  ;;  %p1377_p9 = pnand %p1375_p8, %p1335_p6 }
  0x42   : > { %p1383_p11 = scmp.lt.s32.totalorder %s1381_s24, %s1374_s17 }
  0x43   : > { %p1378_p10 = pneg %p1377_p9 }
  0x44   : > { %p1384_p13 = por %p1383_p11, %p1382_p4 }
  0x46   : > { %p1385_p0 = pnand %p1384_p13, %p1378_p10 }
  0x48   : > { %1388 = shalt.err (!%p1385_p0)
}
  0x49   : > { %s2149_s14 = smov 256   ;;  %s263_s23 = scalar_lea.hbm %s2116_s2, %s1729_s6 }
  0x4a   : > { %1212 = dma.hbm_to_vmem [thread:$0]  (!%p1733_p3), %s215_s13, 512, %s217_s7, %s203_s1, %s2149_s14, %s2149_s14, %s1577_s29  }
  0x4b   : > { %s254_s0 = scalar_lea.vmem [#allocation12], %s1726_s9  ;;  %s1579_s24 = smov [#allocation12]  }
  0x4c   : > { %s264_s11 = sshll.u32 %s254_s0, 4  ;;  %s1407_s28 = sshll.u32 %s1579_s24, 4  ;;  %s265_s11 = int_to_ptr.vmem [resolvable:$true] %s264_s11  ;;  %s1408_s28 = int_to_ptr.vmem [resolvable:$false] %s1407_s28 }
  0x4d   : > { %s1402_s17 = scalar_lea.vmem %s265_s11, 512  ;;  %s1409_s15 = scalar_lea.vmem %s1408_s28, 1024 }
  0x4e   : > { %p1403_p1 = scmp.ne.s32.totalorder %s265_s11, %s1402_s17  ;;  %p1410_p10 = scmp.lt.s32.totalorder %s265_s11, %s1408_s28 }
  0x4f   : > { %p1411_p4 = scmp.lt.s32.totalorder %s1409_s15, %s1402_s17 }
  0x50   : > { %p1405_p8 = pnand %p1403_p1, %p1335_p6 }
  0x51   : > { %p1412_p11 = por %p1411_p4, %p1410_p10 }
  0x52   : > { %p1406_p9 = pneg %p1405_p8 }
  0x54   : > { %p1413_p13 = pnand %p1412_p11, %p1406_p9 }
  0x56   : > { %1416 = shalt.err (!%p1413_p13)
}
  0x57   : > { %1218 = dma.hbm_to_vmem [thread:$0]  (!%p1733_p3), %s263_s23, 512, %s265_s11, %s1744_s18, %s2149_s14, %s2149_s14, %s1577_s29  }
  0x58   : > { %s287_s13 = scalar_lea.hbm %s2117_s3, %s1729_s6  ;;  %s278_s7 = scalar_lea.vmem [#allocation13], %s1726_s9 }
  0x59   : > { %s288_s15 = sshll.u32 %s278_s7, 4  ;;  %s275_s27 = scalar_lea.sflag [#allocation14], %s1719_s10  ;;  %s289_s15 = int_to_ptr.vmem [resolvable:$true] %s288_s15 }
  0x5a   : > { %s1430_s5 = scalar_lea.vmem %s289_s15, 512  ;;  %s1580_s17 = smov [#allocation13]  }
  0x5b   : > { %p1431_p0 = scmp.ne.s32.totalorder %s289_s15, %s1430_s5  ;;  %s1435_s24 = sshll.u32 %s1580_s17, 4  ;;  %s1436_s24 = int_to_ptr.vmem [resolvable:$false] %s1435_s24 }
  0x5c   : > { %s1437_s28 = scalar_lea.vmem %s1436_s24, 1024  ;;  %p1438_p9 = scmp.lt.s32.totalorder %s289_s15, %s1436_s24 }
  0x5d   : > { %p1433_p1 = pnand %p1431_p0, %p1335_p6  ;;  %p1439_p10 = scmp.lt.s32.totalorder %s1437_s28, %s1430_s5 }
  0x5f   : > { %p1434_p8 = pneg %p1433_p1  ;;  %p1440_p4 = por %p1439_p10, %p1438_p9 }
  0x61   : > { %p1441_p11 = pnand %p1440_p4, %p1434_p8 }
  0x63   : > { %1444 = shalt.err (!%p1441_p11)
}
  0x64   : > { %1221 = dma.hbm_to_vmem [thread:$0]  (!%p1733_p3), %s287_s13, 512, %s289_s15, %s275_s27, %s2149_s14, %s2149_s14, %s1577_s29  }
  0x65   : > { %300 = sbr.rel (%p1760_p5) target bundleno = 543 (0x21f), region = 36  ;;  %s302_s18 = sand.u32 (!%p1760_p5), 1, %s1549_s19  }
  0x66   : > { %s1171_s10 = sshll.u32 (!%p1760_p5), %s302_s18, 5  ;;  %s303_s11 = scalar_lea.sflag (!%p1760_p5), [#allocation8], %s302_s18 }
  0x67   : > { %s1809_s9 = scalar_lea.vmem (!%p1760_p5), [#allocation7], %s1171_s10 }
  0x6a   : > { %1516 = dma.done.wait (%p1690_p7), %s303_s11, 512  }
  0x6b   : > { %1518 = vsyncadd (%p1690_p7), %s303_s11, 4294966784  ;;  %s311_s6 = sand.u32 1, %s1666_s26   ;;  %s1816_s29 = scalar_lea.vmem [#allocation10], %s1171_s10 }
  0x6c   : > { %s312_s12 = scalar_lea.sflag [#allocation11], %s311_s6 }
  0x6d   : > { %1520 = dma.done.wait (%p1690_p7), %s312_s12, 1024  }
  0x6e   : > { %1522 = vsyncadd (%p1690_p7), %s312_s12, 4294966272  ;;  %s1822_s20 = scalar_lea.vmem [#allocation12], %s1171_s10  ;;  %s330_s14 = scalar_lea.sflag [#allocation14], %s302_s18 }
  0x6f   : > { %s1824_s23 = scalar_lea.vmem [#allocation13], %s1171_s10 }
  0x70   : > { %1524 = dma.done.wait (%p1690_p7), %s330_s14, 512  }
  0x71   : > { %1526 = vsyncadd (%p1690_p7), %s330_s14, 4294966784  ;;  %s370_s26 = sand.u32 1, %s1537_s16   ;;  %s1176_s0 = sshll.u32 %s1561_s22, 1 }
  0x72   : > { %s1834_s1 = sshll.u32 %s370_s26, 3  ;;  %s1837_s13 = sadd.s32 %s1557_s21, %s1176_s0 }
  0x73   : > { %s1177_s7 = sshll.u32 %s1837_s13, 4  ;;  %s372_s15 = scalar_lea.vmem [#allocation15], %s1834_s1 }
  0x74   : > { %p1178_p3 = scmp.ne.s32.totalorder %s1557_s21, 0 }
  0x76   : > { %391 = sbr.rel (%p1178_p3) target bundleno = 128 (0x80), region = 56 }
  0x7b   : > { %vm392_vm0 = vcmask 0   ;;  %v394_v0 = vlaneseq  ;;  %v1581_v1 = vmov 0.0  }
  0x7c   : > { %393 = vst.msk [vmem:[#allocation3] sm:$0x1] %vm392_vm0, %v1581_v1 }
  0x7d   : > { %vm396_vm1 = vcmp.lt.s32.totalorder %v394_v0, 256 }
  0x7e   : > { %398 = vst.msk [vmem:[#allocation4] sm:$0x3] %vm396_vm1, %v1581_v1  ;;  %399 = vst.msk [vmem:[#allocation5] sm:$0x3] %vm396_vm1, %v1581_v1 }
  0x7f   : > { %400 = vst.msk [vmem:[#allocation6] sm:$0x3] %vm396_vm1, %v1581_v1 }
  0x80 PF: > { %v1843_v2 = vld [vmem:[%s1822_s20] sm:$0xff]  ;;  %v1846_v3 = vld [vmem:[%s1822_s20 + $0x8] sm:$0xff]  ;;  %v1863_v10 = vld [vmem:[%s1822_s20 + $0x10] sm:$0xff]  ;;  %v401_v29 = vlaneseq  ;;  %v1582_v37 = vmov 1966171168   ;;  %p749_p7 = scmp.gt.s32.totalorder %s1557_s21, 0 }
  0x81   : > { %v1849_v4 = vld [vmem:[%s1809_s9] sm:$0xff]  ;;  %v465_v5 = vmul.f32 %v1843_v2, %v1843_v2  ;;  %v466_v6 = vmul.f32 %v1846_v3, %v1846_v3  ;;  %v1856_v7 = vld [vmem:[%s1809_s9 + $0x8] sm:$0xff]  ;;  %v1866_v11 = vld [vmem:[%s1822_s20 + $0x18] sm:$0xff]  ;;  %v467_v14 = vmul.f32 %v1863_v10, %v1863_v10  ;;  %v1906_v38 = vunpack.c.l.s4 %v1582_v37  ;;  %p750_p6 = scmp.lt.s32.totalorder %s1177_s7, 64 }
  0x82   : > { %v455_v8 = vmul.f32 %v1849_v4, %v1849_v4  ;;  %v483_v9 = vsub.f32 %v1843_v2, %v1849_v4  ;;  %v456_v12 = vmul.f32 %v1856_v7, %v1856_v7  ;;  %v484_v13 = vsub.f32 %v1846_v3, %v1856_v7  ;;  %v1877_v16 = vld [vmem:[%s1809_s9 + $0x10] sm:$0xff]  ;;  %v1880_v17 = vld [vmem:[%s1809_s9 + $0x18] sm:$0xff]  ;;  %v534_v41 = vld [vmem:[%s1816_s29] sm:$0xff] }
  0x83   : > { %v468_v15 = vmul.f32 %v1866_v11, %v1866_v11  ;;  %v469_v18 = vadd.f32 %v466_v6, %v465_v5  ;;  %v457_v19 = vmul.f32 %v1877_v16, %v1877_v16  ;;  %v458_v20 = vmul.f32 %v1880_v17, %v1880_v17  ;;  %v1887_v21 = vld [vmem:[%s1816_s29 + $0x10] sm:$0xff]  ;;  %v1892_v25 = vld [vmem:[%s1816_s29 + $0x18] sm:$0xff]  ;;  %v535_v42 = vld [vmem:[%s1816_s29 + $0x8] sm:$0xff]  ;;  %p2010_p5 = pnand %p750_p6, %p749_p7 }
  0x84   : > { %v459_v22 = vadd.f32 %v456_v12, %v455_v8  ;;  %v488_v23 = vmul.f32 %v483_v9, %v483_v9  ;;  %v485_v24 = vsub.f32 %v1863_v10, %v1877_v16  ;;  %v489_v26 = vmul.f32 %v484_v13, %v484_v13  ;;  %v1897_v32 = vld [vmem:[%s1824_s23 + $0x10] sm:$0xff]  ;;  %v1900_v33 = vld [vmem:[%s1824_s23 + $0x18] sm:$0xff]  ;;  %v1918_v48 = vld [vmem:[%s1824_s23] sm:$0xff] }
  0x85   : > { %470 = vadd.xlane.f32.xlu1 %v469_v18  ;;  %v472_v27 = vadd.f32 %v468_v15, %v467_v14  ;;  %v486_v28 = vsub.f32 %v1866_v11, %v1880_v17  ;;  %v462_v30 = vadd.f32 %v458_v20, %v457_v19  ;;  %v550_v34 = vmul.f32 %v1887_v21, %v1887_v21  ;;  %v1921_v50 = vld [vmem:[%s1824_s23 + $0x8] sm:$0xff] }
  0x86   : > { %460 = vadd.xlane.f32.xlu0 %v459_v22  ;;  %v490_v31 = vmul.f32 %v485_v24, %v485_v24  ;;  %v551_v35 = vmul.f32 %v1892_v25, %v1892_v25  ;;  %v578_v39 = vsub.f32 %v1897_v32, %v1887_v21  ;;  %v579_v40 = vsub.f32 %v1900_v33, %v1892_v25 }
  0x87   : > { %v491_v36 = vmul.f32 %v486_v28, %v486_v28  ;;  %v1915_v45 = vshrl.u32 %v401_v29, 7  ;;  %v548_v51 = vmul.f32 %v534_v41, %v534_v41  ;;  %v549_v52 = vmul.f32 %v535_v42, %v535_v42 }
  0x88   : > { %v492_v43 = vadd.f32 %v490_v31, %v488_v23  ;;  %v555_v46 = vadd.f32 %v551_v35, %v550_v34  ;;  %v583_v47 = vmul.f32 %v578_v39, %v578_v39  ;;  %v576_v53 = vsub.f32 %v1918_v48, %v534_v41 }
  0x89   : > { %473 = vadd.xlane.f32.xlu1 %v472_v27  ;;  %v499_v44 = vadd.f32 %v491_v36, %v489_v26  ;;  %v511_v55 = vunpack.c.0.s8 %v1906_v38  ;;  %v584_v56 = vmul.f32 %v579_v40, %v579_v40  ;;  %v577_v57 = vsub.f32 %v1921_v50, %v535_v42 }
  0x8a   : > { %v493_v49 = vrot.slane %v492_v43, 4  ;;  %463 = vadd.xlane.f32.xlu0 %v462_v30  ;;  %v552_v59 = vadd.f32 %v549_v52, %v548_v51  ;;  %v581_v60 = vmul.f32 %v576_v53, %v576_v53  ;;  %v560_v61 = vmul.f32 %v1897_v32, %v1897_v32 }
  0x8b   : > { %v500_v54 = vrot.slane %v499_v44, 4  ;;  %v582_v63 = vmul.f32 %v577_v57, %v577_v57  ;;  %v561_v0 = vmul.f32 %v1900_v33, %v1900_v33  ;;  %v558_v1 = vmul.f32 %v1918_v48, %v1918_v48 }
  0x8c   : > { %v494_v58 = vadd.f32 %v493_v49, %v492_v43  ;;  %v585_v6 = vadd.f32 %v583_v47, %v581_v60  ;;  %v559_v8 = vmul.f32 %v1921_v50, %v1921_v50  ;;  %v445_v9 = vmul.f32 %v1843_v2, %v1849_v4 }
  0x8d   : > { %v501_v62 = vadd.f32 %v500_v54, %v499_v44  ;;  %556 = vadd.xlane.f32.xlu1 %v555_v46  ;;  %v592_v13 = vadd.f32 %v584_v56, %v582_v63  ;;  %v565_v14 = vadd.f32 %v561_v0, %v560_v61  ;;  %v446_v15 = vmul.f32 %v1846_v3, %v1856_v7  ;;  %v487_v44 = vld [vmem:[#allocation4] sm:$0x3] }
  0x8e   : > { %v495_v5 = vrot.slane %v494_v58, 2  ;;  %553 = vadd.xlane.f32.xlu0 %v552_v59  ;;  %v586_v19 = vrot.slane %v585_v6, 4  ;;  %v562_v20 = vadd.f32 %v559_v8, %v558_v1  ;;  %v447_v22 = vmul.f32 %v1863_v10, %v1877_v16 }
  0x8f   : > { %v502_v12 = vrot.slane %v501_v62, 2  ;;  %v593_v24 = vrot.slane %v592_v13, 4  ;;  %v449_v26 = vadd.f32 %v446_v15, %v445_v9  ;;  %v448_v27 = vmul.f32 %v1866_v11, %v1880_v17 }
  0x90   : > { %v496_v18 = vadd.f32 %v495_v5, %v494_v58  ;;  %v587_v4 = vadd.f32 %v586_v19, %v585_v6  ;;  %v540_v28 = vmul.f32 %v1887_v21, %v1897_v32  ;;  %v541_v3 = vmul.f32 %v1892_v25, %v1900_v33 }
  0x91   : > { %v503_v23 = vadd.f32 %v502_v12, %v501_v62  ;;  %566 = vadd.xlane.f32.xlu1 %v565_v14  ;;  %v594_v30 = vadd.f32 %v593_v24, %v592_v13  ;;  %v452_v31 = vadd.f32 %v448_v27, %v447_v22  ;;  %v538_v10 = vmul.f32 %v534_v41, %v1918_v48 }
  0x92   : > { %v497_v2 = vrot.slane %v496_v18, 1  ;;  %563 = vadd.xlane.f32.xlu0 %v562_v20  ;;  %v588_v34 = vrot.slane %v587_v4, 2  ;;  %v539_v35 = vmul.f32 %v535_v42, %v1921_v50  ;;  %v1949_v11 = vsub.s32 %v511_v55, %v1915_v45 }
  0x93   : > { %v504_v7 = vrot.slane %v503_v23, 1  ;;  %v595_v17 = vrot.slane %v594_v30, 2  ;;  %v545_v37 = vadd.f32 %v541_v3, %v540_v28  ;;  %vm1954_vm2 = vcmp.lt.s32.totalorder %v401_v29, 256 }
  0x94   : > { %v498_v16 = vadd.f32 %v497_v2, %v496_v18  ;;  %v589_v21 = vadd.f32 %v588_v34, %v587_v4  ;;  %v542_v38 = vadd.f32 %v539_v35, %v538_v10  ;;  %v403_v51 = vadd.s32 8, %v1915_v45 }
  0x95   : > { %v505_v36 = vadd.f32 %v504_v7, %v503_v23  ;;  %453 = vadd.xlane.f32.xlu1 %v452_v31  ;;  %v596_v39 = vadd.f32 %v595_v17, %v594_v30  ;;  %v640_v53 = vrot.slane %v1897_v32, 1  ;;  %v404_v55 = vstv %s1177_s7 }
  0x96   : > { %450 = vadd.xlane.f32.xlu0 %v449_v26  ;;  %v590_v40 = vrot.slane %v589_v21, 1  ;;  %v641_v56 = vrot.slane %v1900_v33, 1  ;;  %v638_v57 = vrot.slane %v1918_v48, 1  ;;  %v639_v58 = vrot.slane %v1921_v50, 1 }
  0x97   : > { %v508_v25 = vcombine.low %v498_v16, %v505_v36  ;;  %v597_v43 = vrot.slane %v596_v39, 1  ;;  %v406_v59 = vadd.s32 %v404_v55, %v403_v51  ;;  %v1969_v60 = vadd.s32 %v404_v55, %v1915_v45 }
  0x98   : > { %v591_v42 = vadd.f32 %v590_v40, %v589_v21  ;;  %vm642_vm3 = vcmp.lt.s32.totalorder %v1915_v45, 7  ;;  %vm414_vm4 = vcmp.lt.s32.totalorder %v403_v51, 15  ;;  %v1583_v8 = vmov 0.0  }
  0x99   : > { %v515_v41 = vrot.slane %v508_v25, %v1949_v11  ;;  %546 = vadd.xlane.f32.xlu1 %v545_v37  ;;  %v598_v47 = vadd.f32 %v597_v43, %v596_v39  ;;  %v416_v61 = vadd.s32 1, %v406_v59  ;;  %v415_v63 = vadd.s32 1, %v1969_v60 }
  0x9a   : > { %543 = vadd.xlane.f32.xlu0 %v542_v38  ;;  %v645_v0 = vsel %vm642_vm3, %v640_v53, %v638_v57  ;;  %v646_v1 = vsel %vm642_vm3, %v641_v56, %v639_v58  ;;  %v643_v13 = vsel %vm642_vm3, %v638_v57, %v640_v53  ;;  %v644_v14 = vsel %vm642_vm3, %v639_v58, %v641_v56 }
  0x9b   : > { %v522_v46 = vrot.slane %v515_v41, %v1949_v11  ;;  %v601_v54 = vcombine.low %v591_v42, %v598_v47  ;;  %vm418_vm5 = vcmp.lt.s32.totalorder %v416_v61, 64  ;;  %v649_v5 = vsub.f32 %v645_v0, %v1897_v32 }
  0x9c   : > { %vm420_vm6 = vmand %vm414_vm4, %vm418_vm5  ;;  %v650_v6 = vsub.f32 %v646_v1, %v1900_v33  ;;  %vm417_vm7 = vcmp.lt.s32.totalorder %v415_v63, 64  ;;  %v647_v19 = vsub.f32 %v643_v13, %v1918_v48  ;;  %v648_v20 = vsub.f32 %v644_v14, %v1921_v50 }
  0x9d   : > { %v524_v52 = vadd.f32 %v522_v46, %v487_v44  ;;  %v608_v29 = vrot.slane %v601_v54, %v1949_v11  ;;  %v1182_v9 = vsel %vm420_vm6, 1.0, %v1583_v8  ;;  %v1181_v12 = vsel %vm417_vm7, 1.0, %v1583_v8 }
  0x9e   : > { %v653_v15 = vmul.f32 %v1182_v9, %v649_v5  ;;  %v654_v18 = vmul.f32 %v1182_v9, %v650_v6  ;;  %v428_v24 = vadd.s32 2, %v406_v59  ;;  %vm408_vm8 = vcmp.lt.s32.totalorder %v406_v59, 64 }
  0x9f   : > { %529 = vst.msk [vmem:[#allocation4] sm:$0x3] %vm1954_vm2, %v524_v52  ;;  %v615_v62 = vrot.slane %v608_v29, %v1949_v11  ;;  %vm426_vm9 = vcmp.lt.s32.totalorder %v403_v51, 14  ;;  %v427_v27 = vadd.s32 2, %v1969_v60  ;;  %v651_v2 = vmul.f32 %v1181_v12, %v647_v19 }
  0xa0   : > { %v696_v26 = vrot.slane %v653_v15, 1  ;;  %v1989_v4 = vsel %vm408_vm8, 1.0, %v1583_v8  ;;  %vm430_vm10 = vcmp.lt.s32.totalorder %v428_v24, 64  ;;  %v697_v28 = vrot.slane %v654_v18, 1 }
  0xa1   : > { %v652_v3 = vmul.f32 %v1181_v12, %v648_v20  ;;  %vm432_vm11 = vmand %vm426_vm9, %vm430_vm10  ;;  %vm429_vm12 = vcmp.lt.s32.totalorder %v427_v27, 64  ;;  %v694_v7 = vrot.slane %v651_v2, 1  ;;  %v658_v21 = vmul.f32 %v653_v15, %v653_v15 }
  0xa2   : > { %v1184_v31 = vsel %vm432_vm11, 1.0, %v1583_v8  ;;  %v1183_v10 = vsel %vm429_vm12, 1.0, %v1583_v8  ;;  %v659_v38 = vmul.f32 %v654_v18, %v654_v18  ;;  %v656_v25 = vmul.f32 %v651_v2, %v651_v2 }
  0xa3   : > { %v695_v30 = vrot.slane %v652_v3, 1  ;;  %v698_v16 = vsel %vm642_vm3, %v694_v7, %v696_v26  ;;  %v700_v34 = vsel %vm642_vm3, %v696_v26, %v694_v7  ;;  %v657_v39 = vmul.f32 %v652_v3, %v652_v3 }
  0xa4   : > { %v702_v17 = vsub.f32 %v698_v16, %v651_v2  ;;  %v704_v37 = vsub.f32 %v700_v34, %v653_v15  ;;  %v660_v42 = vadd.f32 %v658_v21, %v656_v25  ;;  %vm407_vm13 = vcmp.lt.s32.totalorder %v1969_v60, 64  ;;  %v710_v16 = vld [vmem:[#allocation6] sm:$0x3] }
  0xa5   : > { %v699_v35 = vsel %vm642_vm3, %v695_v30, %v697_v28  ;;  %v701_v36 = vsel %vm642_vm3, %v697_v28, %v695_v30  ;;  %v667_v46 = vadd.f32 %v659_v38, %v657_v39  ;;  %v2000_v56 = vsel %vm407_vm13, 1.0, %v1583_v8  ;;  %v655_v28 = vld [vmem:[#allocation5] sm:$0x3] }
  0xa6   : > { %v580_v22 = vld [vmem:[#allocation4] sm:$0x3]  ;;  %v703_v40 = vsub.f32 %v699_v35, %v652_v3  ;;  %v705_v41 = vsub.f32 %v701_v36, %v654_v18  ;;  %v706_v43 = vmul.f32 %v1183_v10, %v702_v17  ;;  %v708_v44 = vmul.f32 %v1184_v31, %v704_v37 }
  0xa7   : > { %v617_v23 = vadd.f32 %v615_v62, %v580_v22  ;;  %v661_v54 = vrot.slane %v660_v42, 4  ;;  %v668_v55 = vrot.slane %v667_v46, 4  ;;  %vm636_vm14 = vcmask 0  }
  0xa8   : > { %v707_v47 = vmul.f32 %v1183_v10, %v703_v40  ;;  %v709_v51 = vmul.f32 %v1184_v31, %v705_v41  ;;  %v711_v52 = vmul.f32 %v706_v43, %v706_v43  ;;  %v713_v53 = vmul.f32 %v708_v44, %v708_v44 }
  0xa9   : > { %618 = vst.msk [vmem:[#allocation4] sm:$0x3] %vm1954_vm2, %v617_v23  ;;  %v662_v59 = vadd.f32 %v661_v54, %v660_v42  ;;  %v669_v29 = vadd.f32 %v668_v55, %v667_v46 }
  0xaa   : > { %v712_v57 = vmul.f32 %v707_v47, %v707_v47  ;;  %v714_v58 = vmul.f32 %v709_v51, %v709_v51  ;;  %v715_v61 = vadd.f32 %v713_v53, %v711_v52 }
  0xab   : > { %v663_v63 = vrot.slane %v662_v59, 2  ;;  %v670_v0 = vrot.slane %v669_v29, 2 }
  0xac   : > { %v722_v62 = vadd.f32 %v714_v58, %v712_v57  ;;  %v716_v1 = vrot.slane %v715_v61, 4 }
  0xad   : > { %v664_v6 = vadd.f32 %v663_v63, %v662_v59  ;;  %v671_v9 = vadd.f32 %v670_v0, %v669_v29 }
  0xae   : > { %v723_v5 = vrot.slane %v722_v62, 4  ;;  %v717_v12 = vadd.f32 %v716_v1, %v715_v61 }
  0xaf   : > { %v665_v14 = vrot.slane %v664_v6, 1  ;;  %v672_v60 = vrot.slane %v671_v9, 1 }
  0xb0   : > { %v724_v13 = vadd.f32 %v723_v5, %v722_v62  ;;  %v718_v15 = vrot.slane %v717_v12, 2 }
  0xb1   : > { %v666_v18 = vadd.f32 %v665_v14, %v664_v6  ;;  %v673_v19 = vadd.f32 %v672_v60, %v671_v9 }
  0xb2   : > { %v725_v8 = vrot.slane %v724_v13, 2  ;;  %v719_v20 = vadd.f32 %v718_v15, %v717_v12 }
  0xb3   : > { %v676_v23 = vcombine.low %v666_v18, %v673_v19 }
  0xb4   : > { %v726_v22 = vadd.f32 %v725_v8, %v724_v13  ;;  %v720_v24 = vrot.slane %v719_v20, 1 }
  0xb5   : > { %v683_v27 = vrot.slane %v676_v23, %v1949_v11 }
  0xb6   : > { %v727_v26 = vrot.slane %v726_v22, 1  ;;  %v721_v2 = vadd.f32 %v720_v24, %v719_v20  ;;  %v619_v24 = vld [vmem:[#allocation3] sm:$0x1] }
  0xb7   : > { %v690_v7 = vrot.slane %v683_v27, %v1949_v11 }
  0xb8   : > { %v728_v3 = vadd.f32 %v727_v26, %v726_v22 }
  0xb9   : > { %v692_v31 = vadd.f32 %v690_v7, %v655_v28 }
  0xba   : > { %v731_v30 = vcombine.low %v721_v2, %v728_v3 }
  0xbb   : > { %693 = vst.msk [vmem:[#allocation5] sm:$0x3] %vm1954_vm2, %v692_v31 }
  0xbc   : > { %v738_v10 = vrot.slane %v731_v30, %v1949_v11 }
  0xbe   : > { %v745_v34 = vrot.slane %v738_v10, %v1949_v11 }
  0xc0   : > { %v747_v35 = vadd.f32 %v745_v34, %v710_v16 }
  0xc2   : > { %748 = vst.msk [vmem:[#allocation6] sm:$0x3] %vm1954_vm2, %v747_v35 }
 0x10e   : > { %v471_v36 = vpop.xlane.xlu1 %470 }
 0x10f   : > { %v461_v17 = vpop.xlane.xlu0 %460 }
 0x110   : > { %v475_v38 = vmul.f32 %v471_v36, %v461_v17 }
 0x112   : > { %v474_v37 = vpop.xlane.xlu1 %473  ;;  %v477_v43 = vadd.f32 1e-08, %v475_v38 }
 0x113   : > { %v464_v21 = vpop.xlane.xlu0 %463 }
 0x114   : > { %v476_v25 = vmul.f32 %v474_v37, %v464_v21 }
 0x116   : > { %v557_v39 = vpop.xlane.xlu1 %556  ;;  %v478_v40 = vadd.f32 1e-08, %v476_v25 }
 0x117   : > { %v554_v41 = vpop.xlane.xlu0 %553 }
 0x118   : > { %1323 = vrsqrt.f32 %v478_v40 }
 0x119   : > { %1325 = vrsqrt.f32 %v477_v43 }
 0x11a   : > { %v567_v44 = vpop.xlane.xlu1 %566 }
 0x11b   : > { %v569_v42 = vmul.f32 %v567_v44, %v557_v39  ;;  %v564_v46 = vpop.xlane.xlu0 %563 }
 0x11c   : > { %v568_v47 = vmul.f32 %v564_v46, %v554_v41 }
 0x11d   : > { %v571_v51 = vadd.f32 1e-08, %v569_v42 }
 0x11e   : > { %v570_v52 = vadd.f32 1e-08, %v568_v47  ;;  %v454_v53 = vpop.xlane.xlu1 %453 }
 0x11f   : > { %1327 = vrsqrt.f32 %v571_v51  ;;  %v451_v54 = vpop.xlane.xlu0 %450 }
 0x120   : > { %1329 = vrsqrt.f32 %v570_v52 }
 0x122   : > { %v547_v58 = vpop.xlane.xlu1 %546 }
 0x123   : > { %v544_v29 = vpop.xlane.xlu0 %543 }
 0x125   : > { %v1324_v55 = vpop.eup %1323 }
 0x126   : > { %v1326_v57 = vpop.eup %1325  ;;  %v482_v59 = vmul.f32 %v1324_v55, %v454_v53 }
 0x127   : > { %v481_v62 = vmul.f32 %v1326_v57, %v451_v54 }
 0x128   : > { %v623_v5 = vsub.f32 1.0, %v482_v59 }
 0x129   : > { %v622_v9 = vsub.f32 1.0, %v481_v62 }
 0x12c   : > { %v1328_v61 = vpop.eup %1327 }
 0x12d   : > { %v1330_v63 = vpop.eup %1329  ;;  %v575_v0 = vmul.f32 %v1328_v61, %v547_v58 }
 0x12e   : > { %v574_v1 = vmul.f32 %v1330_v63, %v544_v29 }
 0x12f   : > { %v621_v6 = vsub.f32 1.0, %v575_v0 }
 0x130   : > { %v620_v12 = vsub.f32 1.0, %v574_v1 }
 0x131   : > { %v625_v13 = vadd.f32 %v623_v5, %v621_v6 }
 0x132   : > { %v624_v14 = vadd.f32 %v622_v9, %v620_v12 }
 0x133   : > { %v627_v60 = vmul.f32 %v1989_v4, %v625_v13 }
 0x134   : > { %v626_v15 = vmul.f32 %v2000_v56, %v624_v14 }
 0x136   : > { %v628_v8 = vadd.f32 %v627_v60, %v626_v15 }
 0x138   : > { %v629_v18 = vrot.slane %v628_v8, 4 }
 0x13a   : > { %v630_v19 = vadd.f32 %v629_v18, %v628_v8 }
 0x13c   : > { %v631_v20 = vrot.slane %v630_v19, 2 }
 0x13e   : > { %v632_v22 = vadd.f32 %v631_v20, %v630_v19 }
 0x140   : > { %v633_v23 = vrot.slane %v632_v22, 1 }
 0x142   : > { %v634_v26 = vadd.f32 %v633_v23, %v632_v22  ;;  %754 = sbr.rel (%p2010_p5) target bundleno = 351 (0x15f), region = 60 }
 0x144   : > { %v635_v27 = vadd.f32 %v634_v26, %v619_v24 }
 0x146   : > { %637 = vst.msk [vmem:[#allocation3] sm:$0x1] %vm636_vm14, %v635_v27 }
 0x147   : > { %v757_v2 = vld [vmem:[#allocation2 + $0x1] ss:$2 sm:$0x3]  ;;  %v761_v28 = vsub.s32 0, %v1915_v45  ;;  %v765_v4 = vsub.s32 1, %v1915_v45  ;;  %v798_v56 = vmul.f32 2.0, %v1918_v48 }
 0x148   : > { %v755_v3 = vld [vmem:[#allocation2] ss:$2 sm:$0x3]  ;;  %v771_v7 = vmul.f32 2.0, %v757_v2  ;;  %v799_v36 = vmul.f32 2.0, %v1921_v50 }
 0x149   : > { %v762_v30 = vrot.slane %v757_v2, %v761_v28  ;;  %v766_v31 = vrot.slane %v757_v2, %v765_v4  ;;  %v789_v10 = vrot.slane %v755_v3, %v761_v28  ;;  %v793_v16 = vrot.slane %v755_v3, %v765_v4  ;;  %v810_v57 = vld [vmem:[#allocation5] sm:$0x3]  ;;  %v833_v5 = vld [vmem:[#allocation6] sm:$0x3] }
 0x14a   : > { %v776_v34 = vrot.slane %v771_v7, %v761_v28  ;;  %v780_v35 = vrot.slane %v771_v7, %v765_v4  ;;  %v802_v17 = vrot.slane %v798_v56, 7  ;;  %v803_v39 = vrot.slane %v799_v36, 7 }
 0x14b   : > { %v769_v37 = vsub.f32 %v1918_v48, %v762_v30  ;;  %v770_v21 = vsub.f32 %v1921_v50, %v766_v31 }
 0x14c   : > { %v783_v38 = vsub.f32 %v1918_v48, %v776_v34  ;;  %v784_v25 = vsub.f32 %v1921_v50, %v780_v35  ;;  %v806_v40 = vsub.f32 %v1918_v48, %v802_v17  ;;  %v807_v46 = vsub.f32 %v1921_v50, %v803_v39 }
 0x14d   : > { %v811_v41 = vmul.f32 %v769_v37, %v769_v37  ;;  %v812_v43 = vmul.f32 %v770_v21, %v770_v21 }
 0x14e   : > { %v796_v44 = vadd.f32 %v789_v10, %v783_v38  ;;  %v797_v42 = vadd.f32 %v793_v16, %v784_v25  ;;  %v808_v47 = vadd.f32 %v806_v40, %v762_v30  ;;  %v809_v52 = vadd.f32 %v807_v46, %v766_v31 }
 0x14f   : > { %v815_v51 = vcombine.low %v811_v41, %v812_v43 }
 0x150   : > { %v834_v53 = vmul.f32 %v796_v44, %v796_v44  ;;  %v836_v54 = vmul.f32 %v808_v47, %v808_v47  ;;  %v835_v58 = vmul.f32 %v797_v42, %v797_v42  ;;  %v837_v59 = vmul.f32 %v809_v52, %v809_v52 }
 0x151   : > { %v822_v55 = vrot.slane %v815_v51, %v1949_v11 }
 0x152   : > { %v840_v29 = vrot.slane %v836_v54, 1  ;;  %v841_v48 = vrot.slane %v837_v59, 1 }
 0x153   : > { %v829_v61 = vrot.slane %v822_v55, %v1949_v11 }
 0x154   : > { %v844_v62 = vadd.f32 %v840_v29, %v834_v53  ;;  %v845_v0 = vadd.f32 %v841_v48, %v835_v58 }
 0x155   : > { %v831_v63 = vadd.f32 %v829_v61, %v810_v57 }
 0x156   : > { %v848_v50 = vcombine.low %v844_v62, %v845_v0 }
 0x157   : > { %832 = vst.msk [vmem:[#allocation5] sm:$0x3] %vm1954_vm2, %v831_v63 }
 0x158   : > { %v855_v1 = vrot.slane %v848_v50, %v1949_v11 }
 0x15a   : > { %v862_v6 = vrot.slane %v855_v1, %v1949_v11 }
 0x15c   : > { %v864_v9 = vadd.f32 %v862_v6, %v833_v5 }
 0x15e   : > { %865 = vst.msk [vmem:[#allocation6] sm:$0x3] %vm1954_vm2, %v864_v9 }
 0x15f PF: > { %v1584_v12 = vmov 1983009808   ;;  %v868_v14 = vcombine.high %v1897_v32, %v1900_v33  ;;  %p1185_p13 = scmp.ne.s32.totalorder %s1557_s21, 1 }
 0x160   : > { %v870_v13 = vunpack.c.l.s4 %v1584_v12 }
 0x162   : > { %v871_v60 = vunpack.c.0.s8 %v870_v13 }
 0x164   : > { %v874_v15 = vsub.s32 %v871_v60, %v1915_v45 }
 0x166   : > { %v875_v8 = vrot.slane %v868_v14, %v874_v15  ;;  %882 = sbr.rel (%p1185_p13) target bundleno = 520 (0x208), region = 64 }
 0x168   : > { %v876_v18 = vcombine.high %v875_v8, %v875_v8 }
 0x16a   : > { %878 = vst [vmem:[#allocation2] sm:$0xf] %v876_v18 }
 0x16b   : > { %v888_v11 = vsub.s32 0, %v1915_v45  ;;  %v892_v49 = vsub.s32 1, %v1915_v45  ;;  %v919_v19 = vld [vmem:[#allocation6] sm:$0x3]  ;;  %vm896_vm15 = vcmask 1040384   ;;  %v1585_v23 = vmov 0  }
 0x16c   : > { %v884_v20 = vld [vmem:[#allocation4] sm:$0x3]  ;;  %v902_v22 = vld [vmem:[#allocation5] sm:$0x3]  ;;  %1331 = vset.pattern.permute.xlu1 %v1585_v23  ;;  %1332 = vset.pattern.permute.xlu0 %v1585_v23  ;;  %v1186_v34 = vld [vmem:[#allocation3] ss:$0 sm:$0xff] }
 0x16d   : > { %v924_v32 = vrot.slane %v919_v19, %v888_v11  ;;  %v928_v33 = vrot.slane %v919_v19, %v892_v49  ;;  %v889_v24 = vrot.slane %v884_v20, %v888_v11  ;;  %v893_v26 = vrot.slane %v884_v20, %v892_v49 }
 0x16e   : > { %v907_v27 = vrot.slane %v902_v22, %v888_v11  ;;  %v911_v2 = vrot.slane %v902_v22, %v892_v49  ;;  %vm936_vm0 = vcmp.eq.s32.totalorder %v1915_v45, 0  ;;  %vm947_vm1 = vcmp.eq.s32.totalorder %v1915_v45, 1 }
 0x16f   : > { %v931_v28 = vsel %vm896_vm15, %v924_v32, 0.0  ;;  %v932_v4 = vsel %vm896_vm15, %v928_v33, 0.0  ;;  %v897_v56 = vsel %vm896_vm15, %v889_v24, 0.0  ;;  %v898_v3 = vsel %vm896_vm15, %v893_v26, 0.0 }
 0x170   : > { %v933_v7 = vadd.f32 %v932_v4, %v931_v28  ;;  %v899_v30 = vadd.f32 %v898_v3, %v897_v56  ;;  %v914_v31 = vsel %vm896_vm15, %v907_v27, 0.0  ;;  %v915_v10 = vsel %vm896_vm15, %v911_v2, 0.0 }
 0x171   : > { %v916_v16 = vadd.f32 %v915_v10, %v914_v31  ;;  %vm954_vm2 = vcmp.eq.s32.totalorder %v1915_v45, 2  ;;  %vm961_vm3 = vcmp.eq.s32.totalorder %v1915_v45, 3 }
 0x172   : > { %934 = vadd.xlane.f32.xlu1 %v933_v7  ;;  %900 = vadd.xlane.f32.xlu0 %v899_v30 }
 0x176   : > { %917 = vadd.xlane.f32.xlu0 %v916_v16 }
 0x183   : > { %943 = vperm.xlu1 %1331, %v1186_v34  }
 0x1fb   : > { %v935_v35 = vpop.xlane.xlu1 %934  ;;  %v901_v36 = vpop.xlane.xlu0 %900 }
 0x1fc   : > { %v951_v17 = vrot.slane %v901_v36, %v888_v11  ;;  %v965_v38 = vrot.slane %v935_v35, %v888_v11 }
 0x1fe   : > { %v952_v39 = vsel %vm947_vm1, %v951_v17, 0.0  ;;  %v966_v42 = vsel %vm961_vm3, %v965_v38, 0.0 }
 0x1ff   : > { %v918_v37 = vpop.xlane.xlu0 %917  ;;  %v944_v21 = vpop.permute.xlu1 %943 }
 0x200   : > { %v958_v25 = vrot.slane %v918_v37, %v888_v11  ;;  %v946_v40 = vsel %vm936_vm0, %v944_v21, 0.0 }
 0x201   : > { %v953_v41 = vadd.f32 %v952_v39, %v946_v40 }
 0x202   : > { %v959_v43 = vsel %vm954_vm2, %v958_v25, 0.0 }
 0x203   : > { %v960_v44 = vadd.f32 %v959_v43, %v953_v41 }
 0x205   : > { %v967_v46 = vadd.f32 %v966_v42, %v960_v44 }
 0x207   : > { %968 = vst [vmem:[%s372_s15] sm:$0xff] %v967_v46 }
 0x208 PF: > { %s1188_s21 = sshll.u32 %s1561_s22, 7  ;;  %s983_s24 = sshll.u32 %s372_s15, 4  ;;  %s984_s24 = int_to_ptr.vmem [resolvable:$true] %s983_s24 }
 0x209   : > { %s981_s17 = scalar_lea.hbm %s2118_s4, %s1188_s21  ;;  %s970_s28 = scalar_lea.sflag [#allocation9], %s370_s26 }
 0x20a   : > { %s1445_s18 = scalar_lea.vmem %s984_s24, 128  ;;  %s1586_s10 = smov [#allocation15]  }
 0x20b   : > { %p1446_p0 = scmp.ne.s32.totalorder %s984_s24, %s1445_s18  ;;  %s1449_s11 = sshll.u32 %s1586_s10, 4  ;;  %s1450_s11 = int_to_ptr.vmem [resolvable:$false] %s1449_s11 }
 0x20c   : > { %s1451_s9 = scalar_lea.vmem %s1450_s11, 256  ;;  %p1452_p9 = scmp.lt.s32.totalorder %s984_s24, %s1450_s11 }
 0x20d   : > { %p1447_p1 = pnand %p1446_p0, %p1709_p12  ;;  %p1453_p10 = scmp.lt.s32.totalorder %s1451_s9, %s1445_s18 }
 0x20f   : > { %p1448_p8 = pneg %p1447_p1  ;;  %p1454_p4 = por %p1453_p10, %p1452_p9 }
 0x211   : > { %p1455_p11 = pnand %p1454_p4, %p1448_p8 }
 0x213   : > { %1458 = shalt.err (!%p1455_p11)
}
 0x214   : > { %s1459_s22 = scalar_lea.hbm %s981_s17, 128  ;;  %s1463_s29 = scalar_lea.hbm %s2118_s4, 256 }
 0x215   : > { %p1460_p3 = scmp.ne.s32.totalorder %s981_s17, %s1459_s22  ;;  %p1464_p5 = scmp.lt.s32.totalorder %s981_s17, %s2118_s4 }
 0x216   : > { %p1465_p13 = scmp.lt.s32.totalorder %s1463_s29, %s1459_s22 }
 0x217   : > { %p1461_p7 = pnand %p1460_p3, %p1709_p12 }
 0x218   : > { %p1466_p0 = por %p1465_p13, %p1464_p5 }
 0x219   : > { %p1462_p6 = pneg %p1461_p7 }
 0x21b   : > { %p1467_p1 = pnand %p1466_p0, %p1462_p6 }
 0x21d   : > { %1470 = shalt.err (!%p1467_p1)
}
 0x21e   : > { %1207 = dma.vmem_to_hbm [thread:$0]  (%p1709_p12), %s984_s24, 128, %s981_s17, %s970_s28  }
 0x21f PF: > { %s2153_s23 = sld [smem:[#allocation20_spill]]  ;;  %p1227_p8 = scmp.ge.s32.totalorder %s1573_s25, 2 }
 0x221   : > { %p1223_p9 = pnand %p1227_p8, %p1721_p2 }
 0x223   : > { %p1224_p10 = pneg %p1223_p9 }
 0x225   : > { %s995_s0 = sand.u32 1, %s2153_s23  }
 0x226   : > { %s996_s1 = scalar_lea.sflag [#allocation9], %s995_s0 }
 0x227   : > { %1528 = dma.done.wait (%p1224_p10), %s996_s1, 128  }
 0x228   : > { %1530 = vsyncadd (%p1224_p10), %s996_s1, 4294967168  ;;  %s26_s25 = sadd.s32 1, %s1573_s25   ;;  %s2155_s13 = sld [smem:[#allocation21_spill]] }
 0x229   : > { %p23_p4 = scmp.ge.s32.totalorder %s26_s25, 6   ;;  %s2156_s17 = sld [smem:[#allocation27_spill]] }
 0x22a   : > { %s2157_s30 = sld [smem:[#allocation22_spill]]  ;;  %s2163_s15 = smov %s1537_s16 }
 0x22b   : > { %s2158_s20 = sld [smem:[#allocation28_spill]]  ;;  %s2165_s18 = smov %s1549_s19 }
 0x22c   : > { %s2159_s21 = sld [smem:[#allocation23_spill]]  ;;  %25 = sbr.rel (!%p23_p4) target bundleno = 16 (0x10), region = 131 }
 0x22d   : > { %s2160_s22 = sld [smem:[#allocation24_spill]] }
 0x22e   : > { %s2161_s23 = sld [smem:[#allocation25_spill]]  ;;  %s2164_s16 = smov %s2155_s13 }
 0x22f   : > { %s2162_s24 = sld [smem:[#allocation26_spill]] }
 0x230   : > { %s2166_s19 = smov %s2157_s30 }
 0x231   :  { %1001 = vsyncpa [#allocation8], 1 }
 0x232   :  { %1003 = vsyncpa [#allocation8 + $0x1], 1 }
 0x233   :  { %1004 = vsyncpa [#allocation11], 1 }
 0x234   :  { %1006 = vsyncpa [#allocation11 + $0x1], 1 }
 0x235   :  { %1007 = vsyncpa [#allocation14], 1 }
 0x236   :  { %1009 = vsyncpa [#allocation14 + $0x1], 1 }
 0x237   :  { %1010 = vsyncpa [#allocation9], 1 }
 0x238   :  { %1012 = vsyncpa [#allocation9 + $0x1], 1 }

</bundles_post_ra>
